<compile_context>
chip_gen: v7x
topology: tpu7x:2x2x1
jax: 0.10.0
libtpu: 0.0.40
codegen_flags: <defaults>
</compile_context>

<pallas_src>
import functools

import jax
import jax.numpy as jnp
from jax import lax
from jax.experimental import pallas as pl
from jax.experimental.pallas import tpu as pltpu


# ----------------------------------------------------------------------------
# Pallas kernel: one tile of triples per grid step; pooled / count accumulators
# live in VMEM scratch; net2 + object-output write happen on the last step.
# ----------------------------------------------------------------------------
def _graph_triple_conv_kernel(
    s_idx_ref, o_idx_ref,       # (1, tile_T) int32, padded entries = -1
    trip_ref,                   # (tile_T, 3*Din) bf16 : [cur_s | pred | cur_o]
    w1_ref, b1_ref,             # (3*Din, H) bf16, (1, H) f32
    w2_ref, b2_ref,             # (H, 2*H+Dout) bf16, (1, 2*H+Dout) f32
    w3_ref, b3_ref,             # (H, H) bf16, (1, H) f32
    w4_ref, b4_ref,             # (H, Dout) bf16, (1, Dout) f32
    new_obj_ref, new_pred_ref,  # outputs (O_pad, Dout), (tile_T, Dout)
    pooled_acc, count_acc,      # scratch (O_pad, H) f32, (O_pad, 1) f32
):
    t = pl.program_id(0)
    n_t = pl.num_programs(0)
    f32 = jnp.float32
    bf16 = jnp.bfloat16

    O_pad, H = pooled_acc.shape
    Dout = new_pred_ref.shape[1]
    tile_T = trip_ref.shape[0]

    @pl.when(t == 0)
    def _init():
        pooled_acc[...] = jnp.zeros_like(pooled_acc)
        count_acc[...] = jnp.zeros_like(count_acc)

    # net1 layer 1: fused (tile_T, 3*Din) @ (3*Din, H) matmul, bf16 ops / f32 acc.
    h1 = jnp.dot(trip_ref[...], w1_ref[...], preferred_element_type=f32) + b1_ref[...]
    h1 = jnp.maximum(h1, 0.0)

    # net1 layer 2: fused (tile_T, H) @ (H, 2*H+Dout) matmul; 128-aligned slices.
    nt = jnp.dot(h1.astype(bf16), w2_ref[...], preferred_element_type=f32) + b2_ref[...]
    nt = jnp.maximum(nt, 0.0)
    new_s = nt[:, :H]
    new_p = nt[:, H:H + Dout]
    new_o = nt[:, H + Dout:]

    new_pred_ref[...] = new_p.astype(new_pred_ref.dtype)

    # Scatter-add pooling: one-hots built directly as (O_pad, tile_T) so the
    # contraction is a standard matmul over tile_T (no per-step XLU transpose).
    obj_iota = lax.broadcasted_iota(jnp.int32, (O_pad, tile_T), 0)
    s_oh = (s_idx_ref[...] == obj_iota).astype(f32)   # padded (-1) rows -> all-zero
    o_oh = (o_idx_ref[...] == obj_iota).astype(f32)

    pooled_acc[...] += (
        jnp.dot(s_oh.astype(bf16), new_s.astype(bf16), preferred_element_type=f32)
        + jnp.dot(o_oh.astype(bf16), new_o.astype(bf16), preferred_element_type=f32))

    # Degree counts: cross-lane reduce (XLU slot) instead of an N=1 MXU matmul.
    count_acc[...] += jnp.sum(s_oh + o_oh, axis=1, keepdims=True)

    @pl.when(t == n_t - 1)
    def _finalize():
        # avg pooling: multiply by approx reciprocal (free EUP slot).
        inv = pl.reciprocal(jnp.maximum(count_acc[...], 1.0), approx=True)
        pooled = pooled_acc[...] * inv
        # net2: Linear(H -> H) + ReLU, Linear(H -> Dout) + ReLU
        h2 = jnp.maximum(
            jnp.dot(pooled.astype(bf16), w3_ref[...], preferred_element_type=f32)
            + b3_ref[...], 0.0)
        new_obj = jnp.maximum(
            jnp.dot(h2.astype(bf16), w4_ref[...], preferred_element_type=f32)
            + b4_ref[...], 0.0)
        new_obj_ref[...] = new_obj.astype(new_obj_ref.dtype)


# ----------------------------------------------------------------------------
# Wrapper
# ----------------------------------------------------------------------------
def graph_triple_conv(obj_vecs, pred_vecs, edges, params, *,
                      hidden_dim, output_dim, tile_t=256):
    """obj_vecs: (O, Din) f32, pred_vecs: (T, Din) f32, edges: (T, 2) int32."""
    O, Din = obj_vecs.shape
    T = pred_vecs.shape[0]
    H, Dout = hidden_dim, output_dim
    f32, bf16 = jnp.float32, jnp.bfloat16

    assert tile_t % 128 == 0, "tile_t must be a multiple of 128 (lane width)"
    assert Din % 128 == 0 and H % 128 == 0 and Dout % 128 == 0, \
        "Din/H/Dout must be multiples of 128 (lane-aligned fused matmuls/slices)"

    # Pad the index arrays FIRST so the gather directly produces the padded
    # operand (no extra post-gather concatenate passes over HBM); padded triples
    # keep -1 so they never contribute to the in-kernel scatter / counts.
    T_pad = pl.cdiv(T, tile_t) * tile_t
    pad_t = T_pad - T
    s_idx = edges[:, 0].astype(jnp.int32)
    o_idx = edges[:, 1].astype(jnp.int32)
    if pad_t:
        neg = jnp.full((pad_t,), -1, jnp.int32)
        s_idx = jnp.concatenate([s_idx, neg])
        o_idx = jnp.concatenate([o_idx, neg])
        pred_p = jnp.concatenate(
            [pred_vecs, jnp.zeros((pad_t, Din), pred_vecs.dtype)], axis=0)
    else:
        pred_p = pred_vecs

    # Single fused (T_pad, 3*Din) bf16 streamed operand: [cur_s | pred | cur_o].
    gs = jnp.maximum(s_idx, 0)   # clamp padded gather indices (scatter still uses -1)
    go = jnp.maximum(o_idx, 0)
    trip = jnp.concatenate([obj_vecs[gs], pred_p, obj_vecs[go]], axis=1).astype(bf16)

    s_idx_k = s_idx.reshape(1, T_pad)
    o_idx_k = o_idx.reshape(1, T_pad)

    # Pad the object axis to sublane granularity (padded rows sliced off at the end).
    O_pad = pl.cdiv(O, 8) * 8

    def row(v):  # biases as (1, N) f32 so they broadcast over rows in-kernel
        return v.reshape(1, -1).astype(f32)

    inputs = (
        s_idx_k, o_idx_k, trip,
        params["w1"].astype(bf16), row(params["b1"]),
        params["w2"].astype(bf16), row(params["b2"]),
        params["w3"].astype(bf16), row(params["b3"]),
        params["w4"].astype(bf16), row(params["b4"]),
    )

    def resident(arr):  # constant index_map: stays VMEM-resident across grid steps
        return pl.BlockSpec(arr.shape, lambda t: (0, 0))

    in_specs = [
        pl.BlockSpec((1, tile_t), lambda t: (0, t)),     # s_idx tile
        pl.BlockSpec((1, tile_t), lambda t: (0, t)),     # o_idx tile
        pl.BlockSpec((tile_t, 3 * Din), lambda t: (t, 0)),  # triple tile
    ] + [resident(a) for a in inputs[3:]]

    out_specs = [
        pl.BlockSpec((O_pad, Dout), lambda t: (0, 0)),   # new_obj (written last step)
        pl.BlockSpec((tile_t, Dout), lambda t: (t, 0)),  # new_pred (lane-dense tiles)
    ]

    grid = (T_pad // tile_t,)

    # Advisory cost estimate for the XLA scheduler.
    flops = (2 * T_pad * (3 * Din * H + H * (2 * H + Dout))   # net1
             + 2 * 2 * T_pad * O_pad * H                      # scatter-add matmuls
             + 2 * O_pad * (H * H + H * Dout))                # net2
    bytes_accessed = int(sum(a.size * a.dtype.itemsize for a in inputs)
                         + (O_pad * Dout + T_pad * Dout) * 4)
    cost = pl.CostEstimate(flops=int(flops), transcendentals=int(O_pad),
                           bytes_accessed=bytes_accessed)

    new_obj, new_pred = pl.pallas_call(
        _graph_triple_conv_kernel,
        out_shape=(
            jax.ShapeDtypeStruct((O_pad, Dout), obj_vecs.dtype),
            jax.ShapeDtypeStruct((T_pad, Dout), pred_vecs.dtype),
        ),
        grid_spec=pltpu.PrefetchScalarGridSpec(
            num_scalar_prefetch=0,
            grid=grid,
            in_specs=in_specs,
            out_specs=out_specs,
            scratch_shapes=[
                pltpu.VMEM((O_pad, H), jnp.float32),   # pooled accumulator
                pltpu.VMEM((O_pad, 1), jnp.float32),   # degree counts
            ],
        ),
        compiler_params=pltpu.CompilerParams(
            dimension_semantics=("arbitrary",),     # T axis is the pooling reduction
            vmem_limit_bytes=32 * 1024 * 1024,      # fits scoped VMEM on v5e/v6e/v7x
        ),
        cost_estimate=cost,
    )(*inputs)

    return new_obj[:O], new_pred[:T]


# ----------------------------------------------------------------------------
# Deterministic parameter init (mirrors build_mlp: Linear+ReLU for every layer,
# weights kaiming_normal_, biases PyTorch-default uniform).
# ----------------------------------------------------------------------------
def init_params(key, input_dim, hidden_dim, output_dim):
    def linear(key, fan_in, fan_out):
        kw, kb = jax.random.split(key)
        std = (2.0 / fan_in) ** 0.5  # kaiming_normal_ (relu gain), fan_in mode
        w = std * jax.random.normal(kw, (fan_in, fan_out), jnp.float32)
        bound = 1.0 / (fan_in ** 0.5)
        b = jax.random.uniform(kb, (fan_out,), jnp.float32, -bound, bound)
        return w, b

    k1, k2, k3, k4 = jax.random.split(key, 4)
    D, H, Dout = input_dim, hidden_dim, output_dim
    w1, b1 = linear(k1, 3 * D, H)
    w2, b2 = linear(k2, H, 2 * H + Dout)
    w3, b3 = linear(k3, H, H)
    w4, b4 = linear(k4, H, Dout)
    return dict(w1=w1, b1=b1, w2=w2, b2=b2, w3=w3, b3=b3, w4=w4, b4=b4)


# ----------------------------------------------------------------------------
# Pure-JAX reference.  mxu_dtype=f32 reproduces the PyTorch forward exactly;
# mxu_dtype=bf16 additionally emulates the kernel's bf16 MXU operand casts so a
# tight structural check is possible.
# ----------------------------------------------------------------------------
def reference(obj_vecs, pred_vecs, edges, params, *, hidden_dim, output_dim,
              mxu_dtype=jnp.float32):
    f32 = jnp.float32
    O = obj_vecs.shape[0]
    H, Dout = hidden_dim, output_dim
    s_idx = edges[:, 0]
    o_idx = edges[:, 1]

    def mm(x, w):
        return jnp.dot(x.astype(mxu_dtype), w.astype(mxu_dtype),
                       preferred_element_type=f32)

    cur_s = obj_vecs[s_idx]
    cur_o = obj_vecs[o_idx]
    t = jnp.concatenate([cur_s, pred_vecs, cur_o], axis=1)
    h1 = jax.nn.relu(mm(t, params["w1"]) + params["b1"])
    nt = jax.nn.relu(mm(h1, params["w2"]) + params["b2"])
    new_s, new_p, new_o = nt[:, :H], nt[:, H:H + Dout], nt[:, H + Dout:]
    s_add = new_s.astype(mxu_dtype).astype(f32)   # emulate bf16 scatter operands
    o_add = new_o.astype(mxu_dtype).astype(f32)
    pooled = jnp.zeros((O, H), f32).at[s_idx].add(s_add).at[o_idx].add(o_add)
    counts = jnp.zeros((O,), f32).at[s_idx].add(1.0).at[o_idx].add(1.0)
    counts = jnp.maximum(counts, 1.0)
    pooled = pooled / counts[:, None]
    h2 = jax.nn.relu(mm(pooled, params["w3"]) + params["b3"])
    new_obj = jax.nn.relu(mm(h2, params["w4"]) + params["b4"])
    return new_obj, new_p


if __name__ == "__main__":
    # Small but lane-/MXU-friendly synthetic scene graph.
    O, T = 64, 512
    Din, H, Dout = 128, 128, 128
    TILE_T = 256                     # 2 grid steps -> exercises the accumulator path

    key = jax.random.PRNGKey(0)
    k_obj, k_pred, k_edges, k_params = jax.random.split(key, 4)

    obj_vecs = jax.random.normal(k_obj, (O, Din), jnp.float32)
    pred_vecs = jax.random.normal(k_pred, (T, Din), jnp.float32)
    edges = jax.random.randint(k_edges, (T, 2), 0, O, jnp.int32)
    params = init_params(k_params, Din, H, Dout)

    run = jax.jit(functools.partial(graph_triple_conv,
                                    hidden_dim=H, output_dim=Dout, tile_t=TILE_T))
    new_obj, new_pred = run(obj_vecs, pred_vecs, edges, params)
    jax.block_until_ready((new_obj, new_pred))
    assert new_obj.shape == (O, Dout) and new_pred.shape == (T, Dout)

    # Structural check: reference that emulates the kernel's bf16 MXU operands.
    ref_obj_bf, ref_pred_bf = reference(obj_vecs, pred_vecs, edges, params,
                                        hidden_dim=H, output_dim=Dout,
                                        mxu_dtype=jnp.bfloat16)
    assert jnp.allclose(new_obj, ref_obj_bf, atol=2e-2, rtol=2e-2)
    assert jnp.allclose(new_pred, ref_pred_bf, atol=2e-2, rtol=2e-2)

    # Parity with the exact f32 PyTorch forward (tolerance loosened for bf16 MXU).
    ref_obj, ref_pred = reference(obj_vecs, pred_vecs, edges, params,
                                  hidden_dim=H, output_dim=Dout)
    assert jnp.allclose(new_obj, ref_obj, atol=6e-2, rtol=6e-2)
    assert jnp.allclose(new_pred, ref_pred, atol=6e-2, rtol=6e-2)

    print("KERNEL_OK")
</pallas_src>

<mosaic_0001>
module attributes {stable_mosaic.version = 11 : i64} {
  func.func @_graph_triple_conv_kernel(%arg0: i32, %arg1: memref<1x256xi32, #tpu.memory_space<vmem>>, %arg2: memref<1x256xi32, #tpu.memory_space<vmem>>, %arg3: memref<256x384xbf16, #tpu.memory_space<vmem>>, %arg4: memref<384x128xbf16, #tpu.memory_space<vmem>>, %arg5: memref<1x128xf32, #tpu.memory_space<vmem>>, %arg6: memref<128x384xbf16, #tpu.memory_space<vmem>>, %arg7: memref<1x384xf32, #tpu.memory_space<vmem>>, %arg8: memref<128x128xbf16, #tpu.memory_space<vmem>>, %arg9: memref<1x128xf32, #tpu.memory_space<vmem>>, %arg10: memref<128x128xbf16, #tpu.memory_space<vmem>>, %arg11: memref<1x128xf32, #tpu.memory_space<vmem>>, %arg12: memref<64x128xf32, #tpu.memory_space<vmem>>, %arg13: memref<256x128xf32, #tpu.memory_space<vmem>>, %arg14: memref<64x128xf32, #tpu.memory_space<vmem>>, %arg15: memref<64x1xf32, #tpu.memory_space<vmem>>) attributes {dimension_semantics = [#tpu.dimension_semantics<arbitrary>], iteration_bounds = array<i64: 2>, scalar_prefetch = 0 : i64, scratch_operands = 2 : i64, tpu.core_type = #tpu.core_type<tc>, window_params = [{transform_indices = @transform_0, window_bounds = array<i64: 1, 256>}, {transform_indices = @transform_1, window_bounds = array<i64: 1, 256>}, {transform_indices = @transform_2, window_bounds = array<i64: 256, 384>}, {pipeline_mode = #tpu.pipeline_mode<synchronous>, transform_indices = @transform_3, window_bounds = array<i64: 384, 128>}, {pipeline_mode = #tpu.pipeline_mode<synchronous>, transform_indices = @transform_4, window_bounds = array<i64: 1, 128>}, {pipeline_mode = #tpu.pipeline_mode<synchronous>, transform_indices = @transform_5, window_bounds = array<i64: 128, 384>}, {pipeline_mode = #tpu.pipeline_mode<synchronous>, transform_indices = @transform_6, window_bounds = array<i64: 1, 384>}, {pipeline_mode = #tpu.pipeline_mode<synchronous>, transform_indices = @transform_7, window_bounds = array<i64: 128, 128>}, {pipeline_mode = #tpu.pipeline_mode<synchronous>, transform_indices = @transform_8, window_bounds = array<i64: 1, 128>}, {pipeline_mode = #tpu.pipeline_mode<synchronous>, transform_indices = @transform_9, window_bounds = array<i64: 128, 128>}, {pipeline_mode = #tpu.pipeline_mode<synchronous>, transform_indices = @transform_10, window_bounds = array<i64: 1, 128>}, {pipeline_mode = #tpu.pipeline_mode<synchronous>, transform_indices = @transform_11, window_bounds = array<i64: 64, 128>}, {transform_indices = @transform_12, window_bounds = array<i64: 256, 128>}]} {
    %c0_i32 = arith.constant 0 : i32
    %0 = arith.cmpi eq, %arg0, %c0_i32 : i32
    %1 = arith.extui %0 : i1 to i32
    %c0_i32_0 = arith.constant 0 : i32
    %2 = arith.cmpi ne, %1, %c0_i32_0 : i32
    scf.if %2 {
      %cst_31 = arith.constant 0.000000e+00 : f32
      %53 = vector.broadcast %cst_31 : f32 to vector<64x128xf32>
      %c0_32 = arith.constant 0 : index
      %c0_33 = arith.constant 0 : index
      %54 = vector.load %arg14[%c0_32, %c0_33] : memref<64x128xf32, #tpu.memory_space<vmem>>, vector<64x128xf32>
      tpu.vector_store %arg14[%c0_32, %c0_33], %53 {strides = array<i32>} : memref<64x128xf32, #tpu.memory_space<vmem>>, vector<64x128xf32>,
      %cst_34 = arith.constant 0.000000e+00 : f32
      %55 = vector.broadcast %cst_34 : f32 to vector<64x1xf32>
      %c0_35 = arith.constant 0 : index
      %c0_36 = arith.constant 0 : index
      %56 = vector.load %arg15[%c0_35, %c0_36] : memref<64x1xf32, #tpu.memory_space<vmem>>, vector<64x1xf32>
      tpu.vector_store %arg15[%c0_35, %c0_36], %55 {strides = array<i32>} : memref<64x1xf32, #tpu.memory_space<vmem>>, vector<64x1xf32>,
    } else {
    }
    %c0 = arith.constant 0 : index
    %c0_1 = arith.constant 0 : index
    %3 = vector.load %arg3[%c0, %c0_1] : memref<256x384xbf16, #tpu.memory_space<vmem>>, vector<256x384xbf16>
    %c0_2 = arith.constant 0 : index
    %c0_3 = arith.constant 0 : index
    %4 = vector.load %arg4[%c0_2, %c0_3] : memref<384x128xbf16, #tpu.memory_space<vmem>>, vector<384x128xbf16>
    %cst = arith.constant dense<0.000000e+00> : vector<256x128xf32>
    %5 = tpu.matmul %3, %4, %cst {dimension_numbers = #tpu.dot_dimension_numbers<[1], [0], [0], [1], [0, 0, 1, 1], [], []>} : vector<256x384xbf16>, vector<384x128xbf16>, vector<256x128xf32> -> vector<256x128xf32>
    %c0_4 = arith.constant 0 : index
    %c0_5 = arith.constant 0 : index
    %6 = vector.load %arg5[%c0_4, %c0_5] : memref<1x128xf32, #tpu.memory_space<vmem>>, vector<1x128xf32>
    %7 = vector.broadcast %6 : vector<1x128xf32> to vector<256x128xf32>
    %8 = arith.addf %5, %7 : vector<256x128xf32>
    %cst_6 = arith.constant 0.000000e+00 : f32
    %9 = vector.broadcast %cst_6 : f32 to vector<256x128xf32>
    %10 = arith.maximumf %8, %9 : vector<256x128xf32>
    %11 = arith.truncf %10 : vector<256x128xf32> to vector<256x128xbf16>
    %c0_7 = arith.constant 0 : index
    %c0_8 = arith.constant 0 : index
    %12 = vector.load %arg6[%c0_7, %c0_8] : memref<128x384xbf16, #tpu.memory_space<vmem>>, vector<128x384xbf16>
    %cst_9 = arith.constant dense<0.000000e+00> : vector<256x384xf32>
    %13 = tpu.matmul %11, %12, %cst_9 {dimension_numbers = #tpu.dot_dimension_numbers<[1], [0], [0], [1], [0, 0, 1, 1], [], []>} : vector<256x128xbf16>, vector<128x384xbf16>, vector<256x384xf32> -> vector<256x384xf32>
    %c0_10 = arith.constant 0 : index
    %c0_11 = arith.constant 0 : index
    %14 = vector.load %arg7[%c0_10, %c0_11] : memref<1x384xf32, #tpu.memory_space<vmem>>, vector<1x384xf32>
    %15 = vector.broadcast %14 : vector<1x384xf32> to vector<256x384xf32>
    %16 = arith.addf %13, %15 : vector<256x384xf32>
    %cst_12 = arith.constant 0.000000e+00 : f32
    %17 = vector.broadcast %cst_12 : f32 to vector<256x384xf32>
    %18 = arith.maximumf %16, %17 : vector<256x384xf32>
    %19 = vector.extract_strided_slice %18 {offsets = [0, 0], sizes = [256, 128], strides = [1, 1]} : vector<256x384xf32> to vector<256x128xf32>
    %20 = vector.extract_strided_slice %18 {offsets = [0, 128], sizes = [256, 128], strides = [1, 1]} : vector<256x384xf32> to vector<256x128xf32>
    %21 = vector.extract_strided_slice %18 {offsets = [0, 256], sizes = [256, 128], strides = [1, 1]} : vector<256x384xf32> to vector<256x128xf32>
    %c0_13 = arith.constant 0 : index
    %c0_14 = arith.constant 0 : index
    %22 = vector.load %arg13[%c0_13, %c0_14] : memref<256x128xf32, #tpu.memory_space<vmem>>, vector<256x128xf32>
    tpu.vector_store %arg13[%c0_13, %c0_14], %20 {strides = array<i32>} : memref<256x128xf32, #tpu.memory_space<vmem>>, vector<256x128xf32>,
    %23 = tpu.iota {dimensions = array<i32: 0>} : vector<64x256xi32>
    %c0_15 = arith.constant 0 : index
    %c0_16 = arith.constant 0 : index
    %24 = vector.load %arg1[%c0_15, %c0_16] : memref<1x256xi32, #tpu.memory_space<vmem>>, vector<1x256xi32>
    %25 = vector.broadcast %24 : vector<1x256xi32> to vector<64x256xi32>
    %26 = arith.cmpi eq, %25, %23 : vector<64x256xi32>
    %27 = arith.extui %26 : vector<64x256xi1> to vector<64x256xi32>
    %28 = arith.sitofp %27 : vector<64x256xi32> to vector<64x256xf32>
    %c0_17 = arith.constant 0 : index
    %c0_18 = arith.constant 0 : index
    %29 = vector.load %arg2[%c0_17, %c0_18] : memref<1x256xi32, #tpu.memory_space<vmem>>, vector<1x256xi32>
    %30 = vector.broadcast %29 : vector<1x256xi32> to vector<64x256xi32>
    %31 = arith.cmpi eq, %30, %23 : vector<64x256xi32>
    %32 = arith.extui %31 : vector<64x256xi1> to vector<64x256xi32>
    %33 = arith.sitofp %32 : vector<64x256xi32> to vector<64x256xf32>
    %c0_19 = arith.constant 0 : index
    %c0_20 = arith.constant 0 : index
    %34 = vector.load %arg14[%c0_19, %c0_20] : memref<64x128xf32, #tpu.memory_space<vmem>>, vector<64x128xf32>
    %35 = arith.truncf %28 : vector<64x256xf32> to vector<64x256xbf16>
    %36 = arith.truncf %19 : vector<256x128xf32> to vector<256x128xbf16>
    %cst_21 = arith.constant dense<0.000000e+00> : vector<64x128xf32>
    %37 = tpu.matmul %35, %36, %cst_21 {dimension_numbers = #tpu.dot_dimension_numbers<[1], [0], [0], [1], [0, 0, 1, 1], [], []>} : vector<64x256xbf16>, vector<256x128xbf16>, vector<64x128xf32> -> vector<64x128xf32>
    %38 = arith.truncf %33 : vector<64x256xf32> to vector<64x256xbf16>
    %39 = arith.truncf %21 : vector<256x128xf32> to vector<256x128xbf16>
    %cst_22 = arith.constant dense<0.000000e+00> : vector<64x128xf32>
    %40 = tpu.matmul %38, %39, %cst_22 {dimension_numbers = #tpu.dot_dimension_numbers<[1], [0], [0], [1], [0, 0, 1, 1], [], []>} : vector<64x256xbf16>, vector<256x128xbf16>, vector<64x128xf32> -> vector<64x128xf32>
    %41 = arith.addf %37, %40 : vector<64x128xf32>
    %42 = arith.addf %34, %41 : vector<64x128xf32>
    %c0_23 = arith.constant 0 : index
    %c0_24 = arith.constant 0 : index
    %43 = vector.load %arg14[%c0_23, %c0_24] : memref<64x128xf32, #tpu.memory_space<vmem>>, vector<64x128xf32>
    tpu.vector_store %arg14[%c0_23, %c0_24], %42 {strides = array<i32>} : memref<64x128xf32, #tpu.memory_space<vmem>>, vector<64x128xf32>,
    %c0_25 = arith.constant 0 : index
    %c0_26 = arith.constant 0 : index
    %44 = vector.load %arg15[%c0_25, %c0_26] : memref<64x1xf32, #tpu.memory_space<vmem>>, vector<64x1xf32>
    %45 = arith.addf %28, %33 : vector<64x256xf32>
    %cst_27 = arith.constant dense<0.000000e+00> : vector<64xf32>
    %46 = vector.multi_reduction <add>, %45, %cst_27 [1] : vector<64x256xf32> to vector<64xf32>
    %47 = vector.shape_cast %46 : vector<64xf32> to vector<64x1xf32>
    %48 = arith.addf %44, %47 : vector<64x1xf32>
    %c0_28 = arith.constant 0 : index
    %c0_29 = arith.constant 0 : index
    %49 = vector.load %arg15[%c0_28, %c0_29] : memref<64x1xf32, #tpu.memory_space<vmem>>, vector<64x1xf32>
    tpu.vector_store %arg15[%c0_28, %c0_29], %48 {strides = array<i32>} : memref<64x1xf32, #tpu.memory_space<vmem>>, vector<64x1xf32>,
    %c1_i32 = arith.constant 1 : i32
    %50 = arith.cmpi eq, %arg0, %c1_i32 : i32
    %51 = arith.extui %50 : i1 to i32
    %c0_i32_30 = arith.constant 0 : i32
    %52 = arith.cmpi ne, %51, %c0_i32_30 : i32
    scf.if %52 {
      %c0_31 = arith.constant 0 : index
      %c0_32 = arith.constant 0 : index
      %53 = vector.load %arg15[%c0_31, %c0_32] : memref<64x1xf32, #tpu.memory_space<vmem>>, vector<64x1xf32>
      %cst_33 = arith.constant 1.000000e+00 : f32
      %54 = vector.broadcast %cst_33 : f32 to vector<64x1xf32>
      %55 = arith.maximumf %53, %54 : vector<64x1xf32>
      %56 = tpu.reciprocal %55 {approx = true} : vector<64x1xf32> -> vector<64x1xf32>
      %c0_34 = arith.constant 0 : index
      %c0_35 = arith.constant 0 : index
      %57 = vector.load %arg14[%c0_34, %c0_35] : memref<64x128xf32, #tpu.memory_space<vmem>>, vector<64x128xf32>
      %58 = vector.broadcast %56 : vector<64x1xf32> to vector<64x128xf32>
      %59 = arith.mulf %57, %58 : vector<64x128xf32>
      %60 = arith.truncf %59 : vector<64x128xf32> to vector<64x128xbf16>
      %c0_36 = arith.constant 0 : index
      %c0_37 = arith.constant 0 : index
      %61 = vector.load %arg8[%c0_36, %c0_37] : memref<128x128xbf16, #tpu.memory_space<vmem>>, vector<128x128xbf16>
      %cst_38 = arith.constant dense<0.000000e+00> : vector<64x128xf32>
      %62 = tpu.matmul %60, %61, %cst_38 {dimension_numbers = #tpu.dot_dimension_numbers<[1], [0], [0], [1], [0, 0, 1, 1], [], []>} : vector<64x128xbf16>, vector<128x128xbf16>, vector<64x128xf32> -> vector<64x128xf32>
      %c0_39 = arith.constant 0 : index
      %c0_40 = arith.constant 0 : index
      %63 = vector.load %arg9[%c0_39, %c0_40] : memref<1x128xf32, #tpu.memory_space<vmem>>, vector<1x128xf32>
      %64 = vector.broadcast %63 : vector<1x128xf32> to vector<64x128xf32>
      %65 = arith.addf %62, %64 : vector<64x128xf32>
      %cst_41 = arith.constant 0.000000e+00 : f32
      %66 = vector.broadcast %cst_41 : f32 to vector<64x128xf32>
      %67 = arith.maximumf %65, %66 : vector<64x128xf32>
      %68 = arith.truncf %67 : vector<64x128xf32> to vector<64x128xbf16>
      %c0_42 = arith.constant 0 : index
      %c0_43 = arith.constant 0 : index
      %69 = vector.load %arg10[%c0_42, %c0_43] : memref<128x128xbf16, #tpu.memory_space<vmem>>, vector<128x128xbf16>
      %cst_44 = arith.constant dense<0.000000e+00> : vector<64x128xf32>
      %70 = tpu.matmul %68, %69, %cst_44 {dimension_numbers = #tpu.dot_dimension_numbers<[1], [0], [0], [1], [0, 0, 1, 1], [], []>} : vector<64x128xbf16>, vector<128x128xbf16>, vector<64x128xf32> -> vector<64x128xf32>
      %c0_45 = arith.constant 0 : index
      %c0_46 = arith.constant 0 : index
      %71 = vector.load %arg11[%c0_45, %c0_46] : memref<1x128xf32, #tpu.memory_space<vmem>>, vector<1x128xf32>
      %72 = vector.broadcast %71 : vector<1x128xf32> to vector<64x128xf32>
      %73 = arith.addf %70, %72 : vector<64x128xf32>
      %cst_47 = arith.constant 0.000000e+00 : f32
      %74 = vector.broadcast %cst_47 : f32 to vector<64x128xf32>
      %75 = arith.maximumf %73, %74 : vector<64x128xf32>
      %c0_48 = arith.constant 0 : index
      %c0_49 = arith.constant 0 : index
      %76 = vector.load %arg12[%c0_48, %c0_49] : memref<64x128xf32, #tpu.memory_space<vmem>>, vector<64x128xf32>
      tpu.vector_store %arg12[%c0_48, %c0_49], %75 {strides = array<i32>} : memref<64x128xf32, #tpu.memory_space<vmem>>, vector<64x128xf32>,
    } else {
    }
    return
  }
  func.func @transform_0(%arg0: i32) -> (i32, i32) {
    %c0_i32 = arith.constant 0 : i32
    %c0_i32_0 = arith.constant 0 : i32
    return %c0_i32, %arg0 : i32, i32
  }
  func.func @transform_1(%arg0: i32) -> (i32, i32) {
    %c0_i32 = arith.constant 0 : i32
    %c0_i32_0 = arith.constant 0 : i32
    return %c0_i32, %arg0 : i32, i32
  }
  func.func @transform_2(%arg0: i32) -> (i32, i32) {
    %c0_i32 = arith.constant 0 : i32
    %c0_i32_0 = arith.constant 0 : i32
    return %arg0, %c0_i32 : i32, i32
  }
  func.func @transform_3(%arg0: i32) -> (i32, i32) {
    %c0_i32 = arith.constant 0 : i32
    %c0_i32_0 = arith.constant 0 : i32
    %c0_i32_1 = arith.constant 0 : i32
    return %c0_i32, %c0_i32_0 : i32, i32
  }
  func.func @transform_4(%arg0: i32) -> (i32, i32) {
    %c0_i32 = arith.constant 0 : i32
    %c0_i32_0 = arith.constant 0 : i32
    %c0_i32_1 = arith.constant 0 : i32
    return %c0_i32, %c0_i32_0 : i32, i32
  }
  func.func @transform_5(%arg0: i32) -> (i32, i32) {
    %c0_i32 = arith.constant 0 : i32
    %c0_i32_0 = arith.constant 0 : i32
    %c0_i32_1 = arith.constant 0 : i32
    return %c0_i32, %c0_i32_0 : i32, i32
  }
  func.func @transform_6(%arg0: i32) -> (i32, i32) {
    %c0_i32 = arith.constant 0 : i32
    %c0_i32_0 = arith.constant 0 : i32
    %c0_i32_1 = arith.constant 0 : i32
    return %c0_i32, %c0_i32_0 : i32, i32
  }
  func.func @transform_7(%arg0: i32) -> (i32, i32) {
    %c0_i32 = arith.constant 0 : i32
    %c0_i32_0 = arith.constant 0 : i32
    %c0_i32_1 = arith.constant 0 : i32
    return %c0_i32, %c0_i32_0 : i32, i32
  }
  func.func @transform_8(%arg0: i32) -> (i32, i32) {
    %c0_i32 = arith.constant 0 : i32
    %c0_i32_0 = arith.constant 0 : i32
    %c0_i32_1 = arith.constant 0 : i32
    return %c0_i32, %c0_i32_0 : i32, i32
  }
  func.func @transform_9(%arg0: i32) -> (i32, i32) {
    %c0_i32 = arith.constant 0 : i32
    %c0_i32_0 = arith.constant 0 : i32
    %c0_i32_1 = arith.constant 0 : i32
    return %c0_i32, %c0_i32_0 : i32, i32
  }
  func.func @transform_10(%arg0: i32) -> (i32, i32) {
    %c0_i32 = arith.constant 0 : i32
    %c0_i32_0 = arith.constant 0 : i32
    %c0_i32_1 = arith.constant 0 : i32
    return %c0_i32, %c0_i32_0 : i32, i32
  }
  func.func @transform_11(%arg0: i32) -> (i32, i32) {
    %c0_i32 = arith.constant 0 : i32
    %c0_i32_0 = arith.constant 0 : i32
    %c0_i32_1 = arith.constant 0 : i32
    return %c0_i32, %c0_i32_0 : i32, i32
  }
  func.func @transform_12(%arg0: i32) -> (i32, i32) {
    %c0_i32 = arith.constant 0 : i32
    %c0_i32_0 = arith.constant 0 : i32
    return %arg0, %c0_i32 : i32, i32
  }
}

</mosaic_0001>

<bundles_post_ra>
// kernel: graph_triple_conv.1
= control target key start
LH: loop header
LB: loop body
LE: loop exit
PB: predicated region body
PF: predicated region fallthrough
CT: control target
= control target key end

     0   :  { %18 = vsyncpa [#allocation5], 0  ;;  %s5057_s0 = inlined_call_operand.vmem [shape: s32[1,512], index: 0, kind: input, shape index: {}]   ;;  %s5058_s1 = inlined_call_operand.vmem [shape: s32[1,512], index: 1, kind: input, shape index: {}]   ;;  %s5059_s2 = inlined_call_operand.vmem [shape: bf16[512,384], index: 2, kind: input, shape index: {}]   ;;  %s5060_s3 = inlined_call_operand.vmem [shape: bf16[384,128], index: 3, kind: input, shape index: {}]   ;;  %s5061_s4 = inlined_call_operand.vmem [shape: f32[1,128], index: 4, kind: input, shape index: {}]   ;;  %s5062_s5 = inlined_call_operand.vmem [shape: bf16[128,384], index: 5, kind: input, shape index: {}]   ;;  %s5063_s6 = inlined_call_operand.vmem [shape: f32[1,384], index: 6, kind: input, shape index: {}]   ;;  %s5064_s7 = inlined_call_operand.vmem [shape: bf16[128,128], index: 7, kind: input, shape index: {}]   ;;  %s5065_s8 = inlined_call_operand.vmem [shape: f32[1,128], index: 8, kind: input, shape index: {}]   ;;  %s5066_s9 = inlined_call_operand.vmem [shape: bf16[128,128], index: 9, kind: input, shape index: {}]   ;;  %s5067_s10 = inlined_call_operand.vmem [shape: f32[1,128], index: 10, kind: input, shape index: {}]   ;;  %s5068_s11 = inlined_call_operand.hbm [shape: f32[64,128], index: 11, kind: output, shape index: {0}]   ;;  %s5069_s12 = inlined_call_operand.hbm [shape: f32[512,128], index: 12, kind: output, shape index: {1}]  }
   0x1   :  { %19 = vsyncpa [#allocation7], 0 }
   0x2   :  { %21 = vsyncpa [#allocation7 + $0x1], 0  ;;  %s3905_s21 = smov 0   ;;  %s3907_s22 = smov 0  }
   0x3   :  { %s3909_s23 = smov 0   ;;  %s3911_s24 = smov 0  }
   0x4 LB: > { %5108 = sst [smem:[#allocation10_spill]] %s3817_s21  ;;  %s3926_s25 = sadd.s32 4294967295, %s3829_s24   ;;  %s3829_s24 = sphi %s3911_s24, %s5181_s24   ;;  %s3825_s23 = sphi %s3909_s23, %s5183_s23   ;;  %s3821_s22 = sphi %s3907_s22, %s5185_s22   ;;  %s3817_s21 = sphi %s3905_s21, %s5184_s21  }
   0x5   : > { %5109 = sst [smem:[#allocation11_spill]] %s3825_s23  ;;  %s2923_s26 = sadd.s32 4294967294, %s3829_s24  }
   0x6   : > { %s3930_s27 = sadd.s32 1, %s3829_s24   ;;  %s301_s28 = sadd.s32 1, %s3825_s23 }
   0x7   : > { %5110 = sst [smem:[#allocation12_spill]] %s3930_s27  ;;  %s298_s29 = ssub.s32 %s3829_s24, %s3930_s27 }
   0x8   : > { %p311_p0 = scmp.ne.s32.totalorder %s3825_s23, %s3821_s22  ;;  %p299_p1 = scmp.eq.s32.totalorder %s298_s29, 0 }
   0x9   : > { %p312_p2 = scmp.eq.s32.totalorder %s3926_s25, 1  ;;  %p317_p3 = scmp.ne.s32.totalorder %s3821_s22, %s3817_s21 }
   0xa   : > { %p318_p4 = scmp.eq.s32.totalorder %s2923_s26, 1  ;;  %p2926_p7 = scmp.ge.s32.totalorder %s3829_s24, 1 }
   0xb   : > { %s3941_s30 = scalar_select %p299_p1, %s3825_s23, %s301_s28  }
   0xc   : > { %p3945_p5 = por %p312_p2, %p311_p0  ;;  %p3949_p6 = por %p318_p4, %p317_p3 }
   0xd   : > { %5111 = sst [smem:[#allocation13_spill]] %s3941_s30  ;;  %p386_p8 = scmp.lt.s32.totalorder %s3829_s24, 3 }
   0xe   : > { %s5113_s14 = scalar_select %p3949_p6, 1, 0 }
   0xf   : > { %p387_p9 = pnand %p2926_p7, %p386_p8 }
  0x10   : > { %5114 = sst [smem:[#allocation14_spill]] %s5113_s14  ;;  %s5074_s15 = sand.u32 (!%p387_p9), 1, %s3821_s22  }
  0x11   : > { %390 = sbr.rel (%p387_p9) target bundleno = 1509 (0x5e5), region = 64  ;;  %s2928_s16 = sshll.u32 (!%p387_p9), %s3926_s25, 1 }
  0x12   : > { %s2927_s17 = sshll.u32 (!%p387_p9), %s5074_s15, 8  ;;  %p438_p10 = scmp.lt.s32.totalorder (!%p387_p9), %s2928_s16, 3 }
  0x13   : > { %s2930_s18 = sshll.u32 (!%p387_p9), %s3926_s25, 5  ;;  %s3975_s21 = scalar_lea.vmem (!%p387_p9), [#allocation6], %s2927_s17 }
  0x14   : > { %p448_p11 = scmp.lt.s32.totalorder (!%p387_p9), %s2930_s18, 63  ;;  %p2932_p12 = scmp.ne.s32.totalorder (!%p387_p9), %s3926_s25, 0 }
  0x18   : > { %s5187_s16 = smov (!%p438_p10, %s2928_s16), 3  ;;  %s5189_s18 = smov (!%p448_p11, %s2930_s18), 63 }
  0x19   : > { %s440_s26 = scalar_lea.vmem %s5057_s0, %s5187_s16  ;;  %s3529_s23 = smul.u32 12, %s5189_s18  ;;  %vm468_vm0 = vcmask (!%p2932_p12), 7168   ;;  %v3831_v0 = vmov (!%p2932_p12), 0.0  }
  0x1a   : > { %459 = sbr.rel (%p2932_p12) target bundleno = 34 (0x22), region = 68  ;;  %460 = vst [vmem:[#allocation2] sm:$0xff] (!%p2932_p12), %v3831_v0  ;;  %461 = vst [vmem:[#allocation2 + $0x8] sm:$0xff] (!%p2932_p12), %v3831_v0 }
  0x1b   : > { %s3973_s15 = scalar_lea.vmem %s5059_s2, %s3529_s23  ;;  %462 = vst [vmem:[#allocation2 + $0x10] sm:$0xff] (!%p2932_p12), %v3831_v0  ;;  %463 = vst [vmem:[#allocation2 + $0x18] sm:$0xff] (!%p2932_p12), %v3831_v0 }
  0x1c   : > { %464 = vst [vmem:[#allocation2 + $0x20] sm:$0xff] (!%p2932_p12), %v3831_v0  ;;  %465 = vst [vmem:[#allocation2 + $0x28] sm:$0xff] (!%p2932_p12), %v3831_v0 }
  0x1d   : > { %466 = vst [vmem:[#allocation2 + $0x30] sm:$0xff] (!%p2932_p12), %v3831_v0  ;;  %467 = vst [vmem:[#allocation2 + $0x38] sm:$0xff] (!%p2932_p12), %v3831_v0 }
  0x1e   : > { %469 = vst.msk [vmem:[#allocation3] sm:$0xff] (!%p2932_p12), %vm468_vm0, %v3831_v0  ;;  %470 = vst.msk [vmem:[#allocation3 + $0x8] sm:$0xff] (!%p2932_p12), %vm468_vm0, %v3831_v0 }
  0x1f   : > { %471 = vst.msk [vmem:[#allocation3 + $0x10] sm:$0xff] (!%p2932_p12), %vm468_vm0, %v3831_v0  ;;  %472 = vst.msk [vmem:[#allocation3 + $0x18] sm:$0xff] (!%p2932_p12), %vm468_vm0, %v3831_v0 }
  0x20   : > { %473 = vst.msk [vmem:[#allocation3 + $0x20] sm:$0xff] (!%p2932_p12), %vm468_vm0, %v3831_v0  ;;  %474 = vst.msk [vmem:[#allocation3 + $0x28] sm:$0xff] (!%p2932_p12), %vm468_vm0, %v3831_v0 }
  0x21   : > { %475 = vst.msk [vmem:[#allocation3 + $0x30] sm:$0xff] %vm468_vm0, %v3831_v0  ;;  %476 = vst.msk [vmem:[#allocation3 + $0x38] sm:$0xff] %vm468_vm0, %v3831_v0 }
  0x22 PF: > { %v3583_v1 = vld [vmem:[%s5060_s3 + $0x40] sm:$0xff]   ;;  %v3586_v4 = vld [vmem:[%s5060_s3 + $0x48] sm:$0xff]   ;;  %v3589_v7 = vld [vmem:[%s5060_s3 + $0x50] sm:$0xff]   ;;  %s5115_s14 = scalar_lea.vmem %s5058_s1, %s5187_s16  ;;  %p3094_p13 = scmp.ne.s32.totalorder %s3926_s25, 1 }
  0x23   : > { %v3584_v2 = vld [vmem:[%s5060_s3] sm:$0xff]   ;;  %3121 = vmatprep.subr.bf16.mxu0 %v3583_v1  ;;  %v3587_v5 = vld [vmem:[%s5060_s3 + $0x8] sm:$0xff]   ;;  %v3590_v8 = vld [vmem:[%s5060_s3 + $0x10] sm:$0xff]  }
  0x24   : > { %v3585_v3 = vld [vmem:[%s5060_s3 + $0x80] sm:$0xff]   ;;  %3122 = vmatpush3.bf16.msra.mxu0 %v3584_v2  ;;  %v3588_v6 = vld [vmem:[%s5060_s3 + $0x88] sm:$0xff]   ;;  %v3591_v9 = vld [vmem:[%s5060_s3 + $0x90] sm:$0xff]  }
  0x25   : > { %3385 = vmatprep.subr.bf16.mxu1 %v3585_v3  ;;  %3123 = vmatprep.subr.bf16.mxu0 %v3586_v4  ;;  %v3592_v10 = vld [vmem:[%s5060_s3 + $0x58] sm:$0xff]   ;;  %v3595_v13 = vld [vmem:[%s5060_s3 + $0x60] sm:$0xff]   ;;  %v3598_v16 = vld [vmem:[%s5060_s3 + $0x68] sm:$0xff]  }
  0x26   : > { %3386 = vmatpush3.bf16.msra.mxu1 %v3585_v3  ;;  %v3593_v11 = vld [vmem:[%s5060_s3 + $0x18] sm:$0xff]   ;;  %v3597_v14 = vld [vmem:[%s5060_s3 + $0xa0] sm:$0xff]   ;;  %v3600_v17 = vld [vmem:[%s5060_s3 + $0xa8] sm:$0xff]  }
  0x27   : > { %3387 = vmatprep.subr.bf16.mxu1 %v3588_v6  ;;  %v3594_v12 = vld [vmem:[%s5060_s3 + $0x98] sm:$0xff]   ;;  %v3596_v15 = vld [vmem:[%s5060_s3 + $0x20] sm:$0xff]   ;;  %v3599_v18 = vld [vmem:[%s5060_s3 + $0x28] sm:$0xff]  }
  0x28   : > { %3124 = vmatpush3.bf16.msra.mxu0 %v3587_v5  ;;  %v3601_v19 = vld [vmem:[%s5060_s3 + $0x70] sm:$0xff]   ;;  %v3604_v22 = vld [vmem:[%s5060_s3 + $0x78] sm:$0xff]   ;;  %v3607_v27 = vld [vmem:[%s3973_s15] ss:$12 sps:$4 sm:$0xff]  }
  0x29   : > { %3125 = vmatprep.subr.bf16.mxu0 %v3589_v7  ;;  %v3602_v20 = vld [vmem:[%s5060_s3 + $0x30] sm:$0xff]   ;;  %v3606_v23 = vld [vmem:[%s5060_s3 + $0xb8] sm:$0xff]   ;;  %v3611_v29 = vld [vmem:[%s3973_s15 + $0x20] ss:$12 sps:$4 sm:$0xff]  }
  0x2a   : > { %3388 = vmatpush3.bf16.msra.mxu1 %v3588_v6  ;;  %v3603_v21 = vld [vmem:[%s5060_s3 + $0xb0] sm:$0xff]   ;;  %v3605_v26 = vld [vmem:[%s5060_s3 + $0x38] sm:$0xff]   ;;  %v3627_v37 = vld [vmem:[%s3973_s15 + $0x80] ss:$12 sps:$4 sm:$0xff]  }
  0x2b   : > { %3389 = vmatprep.subr.bf16.mxu1 %v3591_v9  ;;  %v3609_v24 = vld [vmem:[%s3973_s15 + $0x4] ss:$12 sps:$4 sm:$0xff]   ;;  %v3610_v25 = vld [vmem:[%s3973_s15 + $0x8] ss:$12 sps:$4 sm:$0xff]   ;;  %v3620_v36 = vld [vmem:[%s3973_s15 + $0x4c] ss:$12 sps:$4 sm:$0xff]  }
  0x2c   : > { %3126 = vmatpush3.bf16.msra.mxu0 %v3590_v8  ;;  %1028 = vmatprep.mubr.bf16.mxu0 %v3609_v24  ;;  %v3612_v28 = vld [vmem:[%s3973_s15 + $0x1c] ss:$12 sps:$4 sm:$0xff]   ;;  %v3618_v30 = vld [vmem:[%s3973_s15 + $0x38] ss:$12 sps:$4 sm:$0xff]   ;;  %v3615_v32 = vld [vmem:[%s3973_s15 + $0x34] ss:$12 sps:$4 sm:$0xff]  }
  0x2d   : > { %3127 = vmatprep.subr.bf16.mxu0 %v3592_v10  ;;  %3401 = vmatprep.mubr.bf16.mxu1 %v3610_v25  ;;  %v3614_v31 = vld [vmem:[%s3973_s15 + $0x18] ss:$12 sps:$4 sm:$0xff]   ;;  %v3619_v33 = vld [vmem:[%s3973_s15 + $0x50] ss:$12 sps:$4 sm:$0xff]   ;;  %v3626_v34 = vld [vmem:[%s3973_s15 + $0x68] ss:$12 sps:$4 sm:$0xff]  }
  0x2e   : > { %3390 = vmatpush3.bf16.msra.mxu1 %v3591_v9  ;;  %v3617_v35 = vld [vmem:[%s3973_s15 + $0x30] ss:$12 sps:$4 sm:$0xff]   ;;  %v3634_v38 = vld [vmem:[%s3973_s15 + $0x98] ss:$12 sps:$4 sm:$0xff]   ;;  %v3622_v39 = vld [vmem:[%s3973_s15 + $0x48] ss:$12 sps:$4 sm:$0xff]  }
  0x2f   : > { %3391 = vmatprep.subr.bf16.mxu1 %v3594_v12  ;;  %v3623_v40 = vld [vmem:[%s3973_s15 + $0x64] ss:$12 sps:$4 sm:$0xff]   ;;  %v3642_v42 = vld [vmem:[%s3973_s15 + $0xc8] ss:$12 sps:$4 sm:$0xff]   ;;  %v3625_v43 = vld [vmem:[%s3973_s15 + $0x60] ss:$12 sps:$4 sm:$0xff]  }
  0x30   : > { %3128 = vmatpush3.bf16.msra.mxu0 %v3593_v11  ;;  %v3635_v41 = vld [vmem:[%s3973_s15 + $0xb0] ss:$12 sps:$4 sm:$0xff]   ;;  %v3643_v45 = vld [vmem:[%s3973_s15 + $0xe0] ss:$12 sps:$4 sm:$0xff]   ;;  %v3650_v48 = vld [vmem:[%s3973_s15 + $0xf8] ss:$12 sps:$4 sm:$0xff]  }
  0x31   : > { %3129 = vmatprep.subr.bf16.mxu0 %v3595_v13  ;;  %v3628_v44 = vld [vmem:[%s3973_s15 + $0x7c] ss:$12 sps:$4 sm:$0xff]   ;;  %v3671_v46 = vld [vmem:[%s5062_s5] ss:$12 sps:$4 sm:$0xff]   ;;  %v3673_v47 = vld [vmem:[%s5062_s5 + $0x4] ss:$12 sps:$4 sm:$0xff]  }
  0x32   : > { %3392 = vmatpush3.bf16.msra.mxu1 %v3594_v12  ;;  %v3676_v49 = vld [vmem:[%s5062_s5 + $0x1c] ss:$12 sps:$4 sm:$0xff]   ;;  %v3674_v50 = vld [vmem:[%s5062_s5 + $0x18] ss:$12 sps:$4 sm:$0xff]   ;;  %v3679_v51 = vld [vmem:[%s5062_s5 + $0x34] ss:$12 sps:$4 sm:$0xff]  }
  0x33   : > { %3393 = vmatprep.subr.bf16.mxu1 %v3597_v14  ;;  %v3680_v52 = vld [vmem:[%s5062_s5 + $0x8] ss:$12 sps:$4 sm:$0xff]   ;;  %v3630_v53 = vld [vmem:[%s3973_s15 + $0x78] ss:$12 sps:$4 sm:$0xff]   ;;  %v3684_v54 = vld [vmem:[%s5062_s5 + $0x20] ss:$12 sps:$4 sm:$0xff]  }
  0x34   : > { %3130 = vmatpush3.bf16.msra.mxu0 %v3596_v15  ;;  %v3631_v55 = vld [vmem:[%s3973_s15 + $0x94] ss:$12 sps:$4 sm:$0xff]   ;;  %v3677_v56 = vld [vmem:[%s5062_s5 + $0x30] ss:$12 sps:$4 sm:$0xff]   ;;  %v3683_v57 = vld [vmem:[%s5062_s5 + $0x4c] ss:$12 sps:$4 sm:$0xff]  }
  0x35   : > { %3131 = vmatprep.subr.bf16.mxu0 %v3598_v16  ;;  %v3651_v58 = vld [vmem:[%s3973_s15 + $0x110] ss:$12 sps:$4 sm:$0xff]   ;;  %v3688_v59 = vld [vmem:[%s5062_s5 + $0x38] ss:$12 sps:$4 sm:$0xff]   ;;  %v3658_v60 = vld [vmem:[%s3973_s15 + $0x128] ss:$12 sps:$4 sm:$0xff]  }
  0x36   : > { %3394 = vmatpush3.bf16.msra.mxu1 %v3597_v14  ;;  %v3681_v61 = vld [vmem:[%s5062_s5 + $0x48] ss:$12 sps:$4 sm:$0xff]   ;;  %v3687_v62 = vld [vmem:[%s5062_s5 + $0x64] ss:$12 sps:$4 sm:$0xff]   ;;  %v3685_v63 = vld [vmem:[%s5062_s5 + $0x60] ss:$12 sps:$4 sm:$0xff]  }
  0x37   : > { %3395 = vmatprep.subr.bf16.mxu1 %v3600_v17  ;;  %v3633_v0 = vld [vmem:[%s3973_s15 + $0x90] ss:$12 sps:$4 sm:$0xff]   ;;  %v3636_v1 = vld [vmem:[%s3973_s15 + $0xac] ss:$12 sps:$4 sm:$0xff]   ;;  %v3638_v4 = vld [vmem:[%s3973_s15 + $0xa8] ss:$12 sps:$4 sm:$0xff]  }
  0x38   : > { %3132 = vmatpush3.bf16.msra.mxu0 %v3599_v18  ;;  %v3659_v2 = vld [vmem:[%s3973_s15 + $0x140] ss:$12 sps:$4 sm:$0xff]   ;;  %v3666_v3 = vld [vmem:[%s3973_s15 + $0x158] ss:$12 sps:$4 sm:$0xff]   ;;  %v3667_v6 = vld [vmem:[%s3973_s15 + $0x170] ss:$12 sps:$4 sm:$0xff]  }
  0x39   : > { %3133 = vmatprep.subr.bf16.mxu0 %v3601_v19  ;;  %v3639_v5 = vld [vmem:[%s3973_s15 + $0xc4] ss:$12 sps:$4 sm:$0xff]   ;;  %v3641_v7 = vld [vmem:[%s3973_s15 + $0xc0] ss:$12 sps:$4 sm:$0xff]   ;;  %v3644_v8 = vld [vmem:[%s3973_s15 + $0xdc] ss:$12 sps:$4 sm:$0xff]  }
  0x3a   : > { %3396 = vmatpush3.bf16.msra.mxu1 %v3600_v17  ;;  %v3646_v9 = vld [vmem:[%s3973_s15 + $0xd8] ss:$12 sps:$4 sm:$0xff]   ;;  %v3647_v10 = vld [vmem:[%s3973_s15 + $0xf4] ss:$12 sps:$4 sm:$0xff]   ;;  %v3649_v11 = vld [vmem:[%s3973_s15 + $0xf0] ss:$12 sps:$4 sm:$0xff]  }
  0x3b   : > { %3397 = vmatprep.subr.bf16.mxu1 %v3603_v21  ;;  %v3652_v12 = vld [vmem:[%s3973_s15 + $0x10c] ss:$12 sps:$4 sm:$0xff]   ;;  %v3691_v13 = vld [vmem:[%s5062_s5 + $0x7c] ss:$12 sps:$4 sm:$0xff]   ;;  %v3655_v17 = vld [vmem:[%s3973_s15 + $0x124] ss:$12 sps:$4 sm:$0xff]  }
  0x3c   : > { %3134 = vmatpush3.bf16.msra.mxu0 %v3602_v20  ;;  %v3692_v14 = vld [vmem:[%s5062_s5 + $0x50] ss:$12 sps:$4 sm:$0xff]   ;;  %v3654_v15 = vld [vmem:[%s3973_s15 + $0x108] ss:$12 sps:$4 sm:$0xff]   ;;  %v3689_v16 = vld [vmem:[%s5062_s5 + $0x78] ss:$12 sps:$4 sm:$0xff]  }
  0x3d   : > { %3135 = vmatprep.subr.bf16.mxu0 %v3604_v22  ;;  %v3695_v18 = vld [vmem:[%s5062_s5 + $0x94] ss:$12 sps:$4 sm:$0xff]   ;;  %v3693_v20 = vld [vmem:[%s5062_s5 + $0x90] ss:$12 sps:$4 sm:$0xff]  }
  0x3e   : > { %3398 = vmatpush3.bf16.msra.mxu1 %v3603_v21  ;;  %v3696_v19 = vld [vmem:[%s5062_s5 + $0x68] ss:$12 sps:$4 sm:$0xff]   ;;  %v3699_v21 = vld [vmem:[%s5062_s5 + $0xac] ss:$12 sps:$4 sm:$0xff]  }
  0x3f   : > { %3399 = vmatprep.subr.bf16.mxu1 %v3606_v23  ;;  %v3700_v22 = vld [vmem:[%s5062_s5 + $0x80] ss:$12 sps:$4 sm:$0xff]   ;;  %v3697_v24 = vld [vmem:[%s5062_s5 + $0xa8] ss:$12 sps:$4 sm:$0xff]  }
  0x40   : > { %3136 = vmatpush3.bf16.msra.mxu0 %v3605_v26  ;;  %v3660_v25 = vld [vmem:[%s3973_s15 + $0x13c] ss:$12 sps:$4 sm:$0xff]   ;;  %v3701_v26 = vld [vmem:[%s5062_s5 + $0x98] ss:$12 sps:$4 sm:$0xff]  }
  0x41   : > { %3433 = vmatprep.subr.bf16.mxu0 %v3680_v52 }
  0x42   : > { %3400 = vmatpush3.bf16.msra.mxu1 %v3606_v23  ;;  %v3657_v23 = vld [vmem:[%s3973_s15 + $0x120] ss:$12 sps:$4 sm:$0xff]  }
  0x43   : > { %1029 = vmatmul.mubr.bf16.vlgmr.msra.gmra.mrb[0].mxu0 %v3607_v27  ;;  %1543 = vmatprep.subr.bf16.mxu1 %v3673_v47  ;;  %v3832_v27 = vmov 0  }
  0x44   : > { %1036 = vmatprep.mubr.bf16.mxu0 %v3612_v28  ;;  %3434 = vmatpush3.bf16.msra.mxu0 %v3680_v52  ;;  %v3702_v28 = vld [vmem:[%s5062_s5 + $0xb0] ss:$12 sps:$4 sm:$0xff]  }
  0x45   : > { %3402 = vmatmul.mubr.bf16.vlgmr.msra.gmra.mrb[0].mxu1 %v3611_v29  ;;  %3435 = vmatprep.subr.bf16.mxu0 %v3684_v54  ;;  %v3662_v29 = vld [vmem:[%s3973_s15 + $0x138] ss:$12 sps:$4 sm:$0xff]  }
  0x46   : > { %3405 = vmatprep.mubr.bf16.mxu1 %v3618_v30  ;;  %1544 = vmatpush1.bf16.msra.mxu1 %v3671_v46  ;;  %v3663_v30 = vld [vmem:[%s3973_s15 + $0x154] ss:$12 sps:$4 sm:$0xff]  }
  0x47   : > { %1545 = vmatprep.subr.bf16.mxu1 %v3676_v49 }
  0x48   : > { %3436 = vmatpush3.bf16.msra.mxu0 %v3684_v54 }
  0x49   : > { %3437 = vmatprep.subr.bf16.mxu0 %v3688_v59 }
  0x4a   : > { %1546 = vmatpush1.bf16.msra.mxu1 %v3674_v50 }
  0x4b   : > { %1037 = vmatmul.mubr.bf16.gmra.mrb[4].mxu0 %v3614_v31  ;;  %1547 = vmatprep.subr.bf16.mxu1 %v3679_v51  ;;  %v3665_v31 = vld [vmem:[%s3973_s15 + $0x150] ss:$12 sps:$4 sm:$0xff]  }
  0x4c   : > { %1044 = vmatprep.mubr.bf16.mxu0 %v3615_v32  ;;  %3438 = vmatpush3.bf16.msra.mxu0 %v3688_v59  ;;  %v3668_v32 = vld [vmem:[%s3973_s15 + $0x16c] ss:$12 sps:$4 sm:$0xff]  }
  0x4d   : > { %3406 = vmatmul.mubr.bf16.gmra.mrb[4].mxu1 %v3619_v33  ;;  %3439 = vmatprep.subr.bf16.mxu0 %v3692_v14  ;;  %v3670_v33 = vld [vmem:[%s3973_s15 + $0x168] ss:$12 sps:$4 sm:$0xff]  }
  0x4e   : > { %3409 = vmatprep.mubr.bf16.mxu1 %v3626_v34  ;;  %1548 = vmatpush1.bf16.msra.mxu1 %v3677_v56 }
  0x4f   : > { %1549 = vmatprep.subr.bf16.mxu1 %v3683_v57 }
  0x50   : > { %3440 = vmatpush3.bf16.msra.mxu0 %v3692_v14 }
  0x51   : > { %3441 = vmatprep.subr.bf16.mxu0 %v3696_v19 }
  0x52   : > { %1550 = vmatpush1.bf16.msra.mxu1 %v3681_v61 }
  0x53   : > { %1045 = vmatmul.mubr.bf16.gmra.mrb[8].mxu0 %v3617_v35  ;;  %1551 = vmatprep.subr.bf16.mxu1 %v3687_v62 }
  0x54   : > { %1052 = vmatprep.mubr.bf16.mxu0 %v3620_v36  ;;  %3442 = vmatpush3.bf16.msra.mxu0 %v3696_v19  ;;  %v4182_v36 = vld [vmem:[%s5061_s4] ss:$0 sm:$0xff] }
  0x55   : > { %3410 = vmatmul.mubr.bf16.gmra.mrb[8].mxu1 %v3627_v37  ;;  %3443 = vmatprep.subr.bf16.mxu0 %v3700_v22 }
  0x56   : > { %3413 = vmatprep.mubr.bf16.mxu1 %v3634_v38  ;;  %1552 = vmatpush1.bf16.msra.mxu1 %v3685_v63 }
  0x57   : > { %1553 = vmatprep.subr.bf16.mxu1 %v3691_v13 }
  0x58   : > { %3444 = vmatpush3.bf16.msra.mxu0 %v3700_v22 }
  0x59   : > { %3445 = vmatprep.subr.bf16.mxu0 %v3701_v26 }
  0x5a   : > { %1554 = vmatpush1.bf16.msra.mxu1 %v3689_v16 }
  0x5b   : > { %1053 = vmatmul.mubr.bf16.gmra.mrb[12].mxu0 %v3622_v39  ;;  %1555 = vmatprep.subr.bf16.mxu1 %v3695_v18 }
  0x5c   : > { %1060 = vmatprep.mubr.bf16.mxu0 %v3623_v40  ;;  %3446 = vmatpush3.bf16.msra.mxu0 %v3701_v26 }
  0x5d   : > { %3414 = vmatmul.mubr.bf16.gmra.mrb[12].mxu1 %v3635_v41  ;;  %3447 = vmatprep.subr.bf16.mxu0 %v3702_v28 }
  0x5e   : > { %3417 = vmatprep.mubr.bf16.mxu1 %v3642_v42  ;;  %1556 = vmatpush1.bf16.msra.mxu1 %v3693_v20 }
  0x5f   : > { %1557 = vmatprep.subr.bf16.mxu1 %v3699_v21 }
  0x60   : > { %3448 = vmatpush3.bf16.msra.mxu0 %v3702_v28 }
  0x62   : > { %1558 = vmatpush1.bf16.msra.mxu1 %v3697_v24 }
  0x63   : > { %1061 = vmatmul.mubr.bf16.gmra.mrb[16].mxu0 %v3625_v43 }
  0x64   : > { %1068 = vmatprep.mubr.bf16.mxu0 %v3628_v44 }
  0x65   : > { %3418 = vmatmul.mubr.bf16.gmra.mrb[16].mxu1 %v3643_v45 }
  0x66   : > { %3421 = vmatprep.mubr.bf16.mxu1 %v3650_v48 }
  0x6b   : > { %1069 = vmatmul.mubr.bf16.gmra.mrb[20].mxu0 %v3630_v53 }
  0x6c   : > { %1076 = vmatprep.mubr.bf16.mxu0 %v3631_v55 }
  0x6d   : > { %3422 = vmatmul.mubr.bf16.gmra.mrb[20].mxu1 %v3651_v58 }
  0x6e   : > { %3425 = vmatprep.mubr.bf16.mxu1 %v3658_v60 }
  0x73   : > { %1077 = vmatmul.mubr.bf16.gmra.mrb[24].mxu0 %v3633_v0 }
  0x74   : > { %1084 = vmatprep.mubr.bf16.mxu0 %v3636_v1 }
  0x75   : > { %3426 = vmatmul.mubr.bf16.gmra.mrb[24].mxu1 %v3659_v2 }
  0x76   : > { %3429 = vmatprep.mubr.bf16.mxu1 %v3666_v3 }
  0x7b   : > { %1085 = vmatmul.mubr.bf16.gmra.mrb[28].mxu0 %v3638_v4 }
  0x7c   : > { %1092 = vmatprep.mubr.bf16.mxu0 %v3639_v5 }
  0x7d   : > { %3430 = vmatmul.mubr.bf16.gmra.mrb[28].mxu1 %v3667_v6 }
  0x7e   : > { %1575 = vmatprep.mubr.bf16.mxu1 %v3832_v27 }
  0x83   : > { %1093 = vmatmul.mubr.bf16.gmra.mrb[32].mxu0 %v3641_v7 }
  0x84   : > { %1100 = vmatprep.mubr.bf16.mxu0 %v3644_v8 }
  0x8b   : > { %1101 = vmatmul.mubr.bf16.gmra.mrb[36].mxu0 %v3646_v9 }
  0x8c   : > { %1108 = vmatprep.mubr.bf16.mxu0 %v3647_v10 }
  0x93   : > { %1109 = vmatmul.mubr.bf16.gmra.mrb[40].mxu0 %v3649_v11 }
  0x94   : > { %1116 = vmatprep.mubr.bf16.mxu0 %v3652_v12 }
  0x9b   : > { %1117 = vmatmul.mubr.bf16.gmra.mrb[44].mxu0 %v3654_v15 }
  0x9c   : > { %1124 = vmatprep.mubr.bf16.mxu0 %v3655_v17 }
  0xa3   : > { %1125 = vmatmul.mubr.bf16.gmra.mrb[48].mxu0 %v3657_v23 }
  0xa4   : > { %1132 = vmatprep.mubr.bf16.mxu0 %v3660_v25 }
  0xab   : > { %1133 = vmatmul.mubr.bf16.gmra.mrb[52].mxu0 %v3662_v29 }
  0xac   : > { %1140 = vmatprep.mubr.bf16.mxu0 %v3663_v30 }
  0xb3   : > { %1141 = vmatmul.mubr.bf16.gmra.mrb[56].mxu0 %v3665_v31 }
  0xb4   : > { %1148 = vmatprep.mubr.bf16.mxu0 %v3668_v32 }
  0xbb   : > { %1149 = vmatmul.mubr.bf16.gmra.mrb[60].mxu0 %v3670_v33 }
 0x116   : > { %v3137_v34 = vpop.f32.mrb[0].mxu0 }
 0x117   : > { %v3138_v35 = vpop.f32.mrb[1].mxu0 }
 0x118   : > { %v3139_v37 = vadd.f32 %v3138_v35, %v3137_v34  ;;  %v3403_v38 = vpop.f32.mrb[0].mxu1  ;;  %v3140_v39 = vpop.f32.mrb[2].mxu0 }
 0x119   : > { %v1191_v40 = vpop.f32.mrb[1].mxu1  ;;  %v3141_v41 = vpop.f32.mrb[3].mxu0 }
 0x11a   : > { %v1031_v42 = vadd.f32 %v3139_v37, %v4182_v36  ;;  %v3142_v43 = vadd.f32 %v3141_v41, %v3140_v39  ;;  %v3404_v44 = vpop.f32.mrb[2].mxu1 }
 0x11b   : > { %v1194_v45 = vpop.f32.mrb[3].mxu1 }
 0x11c   : > { %v1192_v46 = vadd.f32 %v1191_v40, %v1031_v42  ;;  %v1034_v47 = vadd.f32 %v3142_v43, %v4182_v36 }
 0x11e   : > { %v1195_v48 = vadd.f32 %v1194_v45, %v1034_v47  ;;  %v3143_v49 = vpop.f32.mrb[4].mxu0  ;;  %v1318_v51 = vmax.f32 %v1192_v46, 0.0 }
 0x11f   : > { %v3144_v50 = vpop.f32.mrb[5].mxu0 }
 0x120   : > { %v1319_v52 = vmax.f32 %v1195_v48, 0.0  ;;  %v3145_v53 = vadd.f32 %v3144_v50, %v3143_v49  ;;  %v3146_v54 = vpop.f32.mrb[6].mxu0  ;;  %v3407_v55 = vpop.f32.mrb[4].mxu1 }
 0x121   : > { %v3147_v56 = vpop.f32.mrb[7].mxu0  ;;  %v1207_v57 = vpop.f32.mrb[5].mxu1 }
 0x122   : > { %v1350_v58 = vpack.c.bf16 %v1319_v52, %v1318_v51  ;;  %v1039_v59 = vadd.f32 %v3145_v53, %v4182_v36  ;;  %v3148_v60 = vadd.f32 %v3147_v56, %v3146_v54  ;;  %v3408_v61 = vpop.f32.mrb[6].mxu1 }
 0x123   : > { %v1210_v62 = vpop.f32.mrb[7].mxu1 }
 0x124   : > { %v1200_v63 = vadd.f32 %v3403_v38, %v1039_v59  ;;  %v1042_v0 = vadd.f32 %v3148_v60, %v4182_v36  ;;  %1576 = vmatmul.mubr.bf16.vlgmr.msra.gmra.mrb[32].mxu1 %v1350_v58  ;;  %3449 = vmatprep.mubr.bf16.mxu0 %v1350_v58 }
 0x125   : > { %1585 = vmatprep.mubr.bf16.mxu1 %v3832_v27 }
 0x126   : > { %v1203_v1 = vadd.f32 %v3404_v44, %v1042_v0  ;;  %v3149_v2 = vpop.f32.mrb[8].mxu0  ;;  %v1320_v4 = vmax.f32 %v1200_v63, 0.0 }
 0x127   : > { %v3150_v3 = vpop.f32.mrb[9].mxu0 }
 0x128   : > { %v1321_v5 = vmax.f32 %v1203_v1, 0.0  ;;  %v3151_v6 = vadd.f32 %v3150_v3, %v3149_v2  ;;  %v3152_v7 = vpop.f32.mrb[10].mxu0  ;;  %v4189_v8 = vpop.f32.mrb[8].mxu1 }
 0x129   : > { %v3153_v9 = vpop.f32.mrb[11].mxu0  ;;  %v1223_v10 = vpop.f32.mrb[9].mxu1 }
 0x12a   : > { %v1047_v11 = vadd.f32 %v3151_v6, %v4182_v36  ;;  %v3154_v12 = vadd.f32 %v3153_v9, %v3152_v7  ;;  %v1351_v13 = vpack.c.bf16 %v1321_v5, %v1320_v4  ;;  %v4192_v14 = vpop.f32.mrb[10].mxu1 }
 0x12b   : > { %v1226_v15 = vpop.f32.mrb[11].mxu1 }
 0x12c   : > { %v1208_v16 = vadd.f32 %v1207_v57, %v1047_v11  ;;  %v1050_v17 = vadd.f32 %v3154_v12, %v4182_v36  ;;  %1586 = vmatmul.mubr.bf16.gmra.mrb[36].mxu1 %v1351_v13  ;;  %3450 = vmatmul.mubr.bf16.vlgmr.msra.gmra.mrb[64].mxu0 %v1351_v13 }
 0x12d   : > { %1595 = vmatprep.mubr.bf16.mxu1 %v3832_v27 }
 0x12e   : > { %v1211_v18 = vadd.f32 %v1210_v62, %v1050_v17  ;;  %v3155_v19 = vpop.f32.mrb[12].mxu0  ;;  %v1322_v21 = vmax.f32 %v1208_v16, 0.0 }
 0x12f   : > { %v3156_v20 = vpop.f32.mrb[13].mxu0 }
 0x130   : > { %v1323_v22 = vmax.f32 %v1211_v18, 0.0  ;;  %v3157_v23 = vadd.f32 %v3156_v20, %v3155_v19  ;;  %v3158_v24 = vpop.f32.mrb[14].mxu0  ;;  %v4196_v25 = vpop.f32.mrb[12].mxu1 }
 0x131   : > { %v3159_v26 = vpop.f32.mrb[15].mxu0  ;;  %v4198_v28 = vpop.f32.mrb[13].mxu1 }
 0x132   : > { %v1352_v29 = vpack.c.bf16 %v1323_v22, %v1322_v21  ;;  %v1055_v30 = vadd.f32 %v3157_v23, %v4182_v36  ;;  %v3160_v31 = vadd.f32 %v3159_v26, %v3158_v24  ;;  %v4201_v32 = vpop.f32.mrb[14].mxu1 }
 0x133   : > { %v4203_v33 = vpop.f32.mrb[15].mxu1 }
 0x134   : > { %v1216_v34 = vadd.f32 %v3407_v55, %v1055_v30  ;;  %v1058_v35 = vadd.f32 %v3160_v31, %v4182_v36  ;;  %1596 = vmatmul.mubr.bf16.gmra.mrb[40].mxu1 %v1352_v29  ;;  %3453 = vmatprep.mubr.bf16.mxu0 %v1352_v29 }
 0x135   : > { %1605 = vmatprep.mubr.bf16.mxu1 %v3832_v27 }
 0x136   : > { %v1219_v37 = vadd.f32 %v3408_v61, %v1058_v35  ;;  %v3161_v38 = vpop.f32.mrb[16].mxu0  ;;  %v1324_v40 = vmax.f32 %v1216_v34, 0.0 }
 0x137   : > { %v3162_v39 = vpop.f32.mrb[17].mxu0 }
 0x138   : > { %v1325_v41 = vmax.f32 %v1219_v37, 0.0  ;;  %v3163_v42 = vadd.f32 %v3162_v39, %v3161_v38  ;;  %v3164_v43 = vpop.f32.mrb[18].mxu0  ;;  %v4207_v44 = vpop.f32.mrb[16].mxu1 }
 0x139   : > { %v3165_v45 = vpop.f32.mrb[19].mxu0  ;;  %v4209_v46 = vpop.f32.mrb[17].mxu1 }
 0x13a   : > { %v1063_v47 = vadd.f32 %v3163_v42, %v4182_v36  ;;  %v3166_v48 = vadd.f32 %v3165_v45, %v3164_v43  ;;  %v1353_v49 = vpack.c.bf16 %v1325_v41, %v1324_v40  ;;  %v4212_v50 = vpop.f32.mrb[18].mxu1 }
 0x13b   : > { %v4214_v51 = vpop.f32.mrb[19].mxu1 }
 0x13c   : > { %v1224_v52 = vadd.f32 %v1223_v10, %v1063_v47  ;;  %v1066_v53 = vadd.f32 %v3166_v48, %v4182_v36  ;;  %1606 = vmatmul.mubr.bf16.gmra.mrb[44].mxu1 %v1353_v49  ;;  %3454 = vmatmul.mubr.bf16.gmra.mrb[68].mxu0 %v1353_v49 }
 0x13d   : > { %1615 = vmatprep.mubr.bf16.mxu1 %v3832_v27 }
 0x13e   : > { %v1227_v54 = vadd.f32 %v1226_v15, %v1066_v53  ;;  %v3167_v55 = vpop.f32.mrb[20].mxu0  ;;  %v1326_v57 = vmax.f32 %v1224_v52, 0.0 }
 0x13f   : > { %v3168_v56 = vpop.f32.mrb[21].mxu0 }
 0x140   : > { %v1327_v58 = vmax.f32 %v1227_v54, 0.0  ;;  %v3169_v59 = vadd.f32 %v3168_v56, %v3167_v55  ;;  %v3170_v60 = vpop.f32.mrb[22].mxu0  ;;  %v4218_v61 = vpop.f32.mrb[20].mxu1 }
 0x141   : > { %v3171_v62 = vpop.f32.mrb[23].mxu0  ;;  %v4220_v63 = vpop.f32.mrb[21].mxu1 }
 0x142   : > { %v1354_v0 = vpack.c.bf16 %v1327_v58, %v1326_v57  ;;  %v1071_v1 = vadd.f32 %v3169_v59, %v4182_v36  ;;  %v3172_v2 = vadd.f32 %v3171_v62, %v3170_v60  ;;  %v4223_v3 = vpop.f32.mrb[22].mxu1 }
 0x143   : > { %v4225_v4 = vpop.f32.mrb[23].mxu1 }
 0x144   : > { %v1232_v5 = vadd.f32 %v4189_v8, %v1071_v1  ;;  %v1074_v6 = vadd.f32 %v3172_v2, %v4182_v36  ;;  %1616 = vmatmul.mubr.bf16.gmra.mrb[48].mxu1 %v1354_v0  ;;  %3457 = vmatprep.mubr.bf16.mxu0 %v1354_v0 }
 0x145   : > { %1625 = vmatprep.mubr.bf16.mxu1 %v3832_v27 }
 0x146   : > { %v1235_v7 = vadd.f32 %v4192_v14, %v1074_v6  ;;  %v3173_v9 = vpop.f32.mrb[24].mxu0  ;;  %v1328_v11 = vmax.f32 %v1232_v5, 0.0 }
 0x147   : > { %v3174_v10 = vpop.f32.mrb[25].mxu0 }
 0x148   : > { %v1329_v12 = vmax.f32 %v1235_v7, 0.0  ;;  %v3175_v13 = vadd.f32 %v3174_v10, %v3173_v9  ;;  %v3176_v15 = vpop.f32.mrb[26].mxu0  ;;  %v4231_v16 = vpop.f32.mrb[24].mxu1 }
 0x149   : > { %v3177_v17 = vpop.f32.mrb[27].mxu0  ;;  %v4233_v18 = vpop.f32.mrb[25].mxu1 }
 0x14a   : > { %v1079_v8 = vadd.f32 %v3175_v13, %v4182_v36  ;;  %v3178_v19 = vadd.f32 %v3177_v17, %v3176_v15  ;;  %v1355_v20 = vpack.c.bf16 %v1329_v12, %v1328_v11  ;;  %v4236_v21 = vpop.f32.mrb[26].mxu1 }
 0x14b   : > { %v4238_v22 = vpop.f32.mrb[27].mxu1 }
 0x14c   : > { %v1240_v14 = vadd.f32 %v4198_v28, %v1079_v8  ;;  %v1082_v23 = vadd.f32 %v3178_v19, %v4182_v36  ;;  %1626 = vmatmul.mubr.bf16.gmra.mrb[52].mxu1 %v1355_v20  ;;  %3458 = vmatmul.mubr.bf16.gmra.mrb[72].mxu0 %v1355_v20 }
 0x14d   : > { %1635 = vmatprep.mubr.bf16.mxu1 %v3832_v27 }
 0x14e   : > { %v1243_v24 = vadd.f32 %v4203_v33, %v1082_v23  ;;  %v3179_v26 = vpop.f32.mrb[28].mxu0  ;;  %v1330_v30 = vmax.f32 %v1240_v14, 0.0 }
 0x14f   : > { %v3180_v29 = vpop.f32.mrb[29].mxu0 }
 0x150   : > { %v1331_v31 = vmax.f32 %v1243_v24, 0.0  ;;  %v3181_v34 = vadd.f32 %v3180_v29, %v3179_v26  ;;  %v3182_v35 = vpop.f32.mrb[30].mxu0  ;;  %v4244_v37 = vpop.f32.mrb[28].mxu1 }
 0x151   : > { %v3183_v38 = vpop.f32.mrb[31].mxu0  ;;  %v4246_v39 = vpop.f32.mrb[29].mxu1 }
 0x152   : > { %v1356_v28 = vpack.c.bf16 %v1331_v31, %v1330_v30  ;;  %v1087_v40 = vadd.f32 %v3181_v34, %v4182_v36  ;;  %v3184_v41 = vadd.f32 %v3183_v38, %v3182_v35  ;;  %v4249_v42 = vpop.f32.mrb[30].mxu1 }
 0x153   : > { %v4251_v43 = vpop.f32.mrb[31].mxu1 }
 0x154   : > { %v1248_v33 = vadd.f32 %v4196_v25, %v1087_v40  ;;  %v1090_v45 = vadd.f32 %v3184_v41, %v4182_v36  ;;  %1636 = vmatmul.mubr.bf16.gmra.mrb[56].mxu1 %v1356_v28  ;;  %3461 = vmatprep.mubr.bf16.mxu0 %v1356_v28 }
 0x155   : > { %1645 = vmatprep.mubr.bf16.mxu1 %v3832_v27 }
 0x156   : > { %v1251_v47 = vadd.f32 %v4201_v32, %v1090_v45  ;;  %v3185_v48 = vpop.f32.mrb[32].mxu0  ;;  %v1332_v52 = vmax.f32 %v1248_v33, 0.0 }
 0x157   : > { %v3186_v49 = vpop.f32.mrb[33].mxu0 }
 0x158   : > { %v1333_v53 = vmax.f32 %v1251_v47, 0.0  ;;  %v3187_v54 = vadd.f32 %v3186_v49, %v3185_v48  ;;  %v3188_v55 = vpop.f32.mrb[34].mxu0 }
 0x159   : > { %v3189_v56 = vpop.f32.mrb[35].mxu0 }
 0x15a   : > { %v1095_v57 = vadd.f32 %v3187_v54, %v4182_v36  ;;  %v3190_v58 = vadd.f32 %v3189_v56, %v3188_v55  ;;  %v1357_v59 = vpack.c.bf16 %v1333_v53, %v1332_v52 }
 0x15c   : > { %v1256_v25 = vadd.f32 %v4209_v46, %v1095_v57  ;;  %v1098_v60 = vadd.f32 %v3190_v58, %v4182_v36  ;;  %1646 = vmatmul.mubr.bf16.gmra.mrb[60].mxu1 %v1357_v59  ;;  %3462 = vmatmul.mubr.bf16.gmra.mrb[76].mxu0 %v1357_v59 }
 0x15d   : > { %1655 = vmatprep.mubr.bf16.mxu1 %v3832_v27 }
 0x15e   : > { %v1259_v32 = vadd.f32 %v4214_v51, %v1098_v60  ;;  %v3191_v62 = vpop.f32.mrb[36].mxu0  ;;  %v1334_v1 = vmax.f32 %v1256_v25, 0.0 }
 0x15f   : > { %v3192_v0 = vpop.f32.mrb[37].mxu0 }
 0x160   : > { %v1335_v2 = vmax.f32 %v1259_v32, 0.0  ;;  %v3193_v5 = vadd.f32 %v3192_v0, %v3191_v62  ;;  %v3194_v6 = vpop.f32.mrb[38].mxu0 }
 0x161   : > { %v3195_v7 = vpop.f32.mrb[39].mxu0 }
 0x162   : > { %v1358_v9 = vpack.c.bf16 %v1335_v2, %v1334_v1  ;;  %v1103_v10 = vadd.f32 %v3193_v5, %v4182_v36  ;;  %v3196_v11 = vadd.f32 %v3195_v7, %v3194_v6 }
 0x164   : > { %v1264_v46 = vadd.f32 %v4207_v44, %v1103_v10  ;;  %v1106_v12 = vadd.f32 %v3196_v11, %v4182_v36  ;;  %1656 = vmatmul.mubr.bf16.gmra.mrb[64].mxu1 %v1358_v9  ;;  %3465 = vmatprep.mubr.bf16.mxu0 %v1358_v9 }
 0x165   : > { %1665 = vmatprep.mubr.bf16.mxu1 %v3832_v27 }
 0x166   : > { %v1267_v51 = vadd.f32 %v4212_v50, %v1106_v12  ;;  %v3197_v13 = vpop.f32.mrb[40].mxu0  ;;  %v1336_v17 = vmax.f32 %v1264_v46, 0.0 }
 0x167   : > { %v3198_v15 = vpop.f32.mrb[41].mxu0 }
 0x168   : > { %v1337_v8 = vmax.f32 %v1267_v51, 0.0  ;;  %v3199_v19 = vadd.f32 %v3198_v15, %v3197_v13  ;;  %v3200_v20 = vpop.f32.mrb[42].mxu0 }
 0x169   : > { %v3201_v14 = vpop.f32.mrb[43].mxu0 }
 0x16a   : > { %v3202_v23 = vadd.f32 %v3201_v14, %v3200_v20  ;;  %v1111_v24 = vadd.f32 %v3199_v19, %v4182_v36  ;;  %v1359_v26 = vpack.c.bf16 %v1337_v8, %v1336_v17 }
 0x16c   : > { %v1272_v44 = vadd.f32 %v4220_v63, %v1111_v24  ;;  %1666 = vmatmul.mubr.bf16.gmra.mrb[68].mxu1 %v1359_v26  ;;  %3466 = vmatmul.mubr.bf16.gmra.mrb[80].mxu0 %v1359_v26  ;;  %v1114_v29 = vadd.f32 %v3202_v23, %v4182_v36 }
 0x16d   : > { %1675 = vmatprep.mubr.bf16.mxu1 %v3832_v27 }
 0x16e   : > { %v1275_v50 = vadd.f32 %v4225_v4, %v1114_v29  ;;  %v3203_v30 = vpop.f32.mrb[44].mxu0  ;;  %v1338_v34 = vmax.f32 %v1272_v44, 0.0 }
 0x16f   : > { %v3204_v31 = vpop.f32.mrb[45].mxu0 }
 0x170   : > { %v1339_v35 = vmax.f32 %v1275_v50, 0.0  ;;  %v3205_v38 = vadd.f32 %v3204_v31, %v3203_v30  ;;  %v3206_v28 = vpop.f32.mrb[46].mxu0 }
 0x171   : > { %v3207_v40 = vpop.f32.mrb[47].mxu0 }
 0x172   : > { %v1360_v41 = vpack.c.bf16 %v1339_v35, %v1338_v34  ;;  %v1119_v33 = vadd.f32 %v3205_v38, %v4182_v36  ;;  %v3208_v45 = vadd.f32 %v3207_v40, %v3206_v28 }
 0x174   : > { %v1280_v63 = vadd.f32 %v4218_v61, %v1119_v33  ;;  %v1122_v47 = vadd.f32 %v3208_v45, %v4182_v36  ;;  %1676 = vmatmul.mubr.bf16.gmra.mrb[72].mxu1 %v1360_v41  ;;  %3469 = vmatprep.mubr.bf16.mxu0 %v1360_v41  ;;  %v1400_v33 = vlaneseq }
 0x175   : > { %1685 = vmatprep.mubr.bf16.mxu1 %v3832_v27 }
 0x176   : > { %v1283_v4 = vadd.f32 %v4223_v3, %v1122_v47  ;;  %v3209_v48 = vpop.f32.mrb[48].mxu0  ;;  %v1340_v52 = vmax.f32 %v1280_v63, 0.0  ;;  %v4297_v45 = vshrl.u32 %v1400_v33, 7  ;;  %v2353_v33 = vld [vmem:[#allocation3 + $0x18] sm:$0xff] }
 0x177   : > { %v3210_v49 = vpop.f32.mrb[49].mxu0 }
 0x178   : > { %v1341_v53 = vmax.f32 %v1283_v4, 0.0  ;;  %v3211_v54 = vadd.f32 %v3210_v49, %v3209_v48  ;;  %v3212_v55 = vpop.f32.mrb[50].mxu0  ;;  %v1402_v63 = vsub.s32 0, %v4297_v45  ;;  %v1410_v47 = vsub.s32 2, %v4297_v45 }
 0x179   : > { %v3213_v56 = vpop.f32.mrb[51].mxu0 }
 0x17a   : > { %v3214_v57 = vadd.f32 %v3213_v56, %v3212_v55  ;;  %v1127_v58 = vadd.f32 %v3211_v54, %v4182_v36  ;;  %v1361_v59 = vpack.c.bf16 %v1341_v53, %v1340_v52  ;;  %v2034_v52 = vld [vmem:[%s440_s26] sm:$0x3]  ;;  %v4317_v55 = vadd.s32 8, %v4297_v45 }
 0x17c   : > { %v1288_v61 = vadd.f32 %v4233_v18, %v1127_v58  ;;  %1686 = vmatmul.mubr.bf16.gmra.mrb[76].mxu1 %v1361_v59  ;;  %3470 = vmatmul.mubr.bf16.gmra.mrb[84].mxu0 %v1361_v59  ;;  %v1130_v25 = vadd.f32 %v3214_v57, %v4182_v36 }
 0x17d   : > { %1695 = vmatprep.mubr.bf16.mxu1 %v3832_v27 }
 0x17e   : > { %v1291_v3 = vadd.f32 %v4238_v22, %v1130_v25  ;;  %v3215_v60 = vpop.f32.mrb[52].mxu0  ;;  %v1342_v62 = vmax.f32 %v1288_v61, 0.0  ;;  %v4324_v25 = vrot.slane %v2034_v52, %v1402_v63 }
 0x17f   : > { %v3216_v32 = vpop.f32.mrb[53].mxu0 }
 0x180   : > { %v1343_v0 = vmax.f32 %v1291_v3, 0.0  ;;  %v3217_v1 = vadd.f32 %v3216_v32, %v3215_v60  ;;  %v3218_v2 = vpop.f32.mrb[54].mxu0  ;;  %v2091_v32 = vld [vmem:[%s5115_s14] sm:$0x3]  ;;  %vm5087_vm4 = vcmp.eq.s32.totalorder %v4324_v25, %v4297_v45  ;;  %vm5079_vm5 = vcmp.eq.s32.totalorder %v4324_v25, %v4317_v55 }
 0x181   : > { %v3219_v5 = vpop.f32.mrb[55].mxu0  ;;  %vm4364_vm8 = vmpackc.low %vm5079_vm5, %vm5087_vm4 }
 0x182   : > { %v1362_v6 = vpack.c.bf16 %v1343_v0, %v1342_v62  ;;  %v1135_v7 = vadd.f32 %v3217_v1, %v4182_v36  ;;  %v3220_v9 = vadd.f32 %v3219_v5, %v3218_v2  ;;  %v4347_v2 = vrot.slane %v2091_v32, %v1402_v63 }
 0x183   : > { %v3833_v5 = vmov 1.0|1.0  }
 0x184   : > { %v1296_v18 = vadd.f32 %v4231_v16, %v1135_v7  ;;  %v1138_v10 = vadd.f32 %v3220_v9, %v4182_v36  ;;  %1696 = vmatmul.mubr.bf16.gmra.mrb[80].mxu1 %v1362_v6  ;;  %3473 = vmatprep.mubr.bf16.mxu0 %v1362_v6  ;;  %vm5085_vm10 = vcmp.eq.s32.totalorder %v4347_v2, %v4297_v45  ;;  %v2350_v7 = vld [vmem:[#allocation3] sm:$0xff] }
 0x185   : > { %1705 = vmatprep.mubr.bf16.mxu1 %v3832_v27  ;;  %vm5077_vm11 = vcmp.eq.s32.totalorder %v4347_v2, %v4317_v55 }
 0x186   : > { %v1299_v22 = vadd.f32 %v4236_v21, %v1138_v10  ;;  %v3221_v11 = vpop.f32.mrb[56].mxu0  ;;  %v1344_v12 = vmax.f32 %v1296_v18, 0.0  ;;  %vm4388_vm12 = vmpackc.low %vm5077_vm11, %vm5085_vm10 }
 0x187   : > { %v3222_v46 = vpop.f32.mrb[57].mxu0 }
 0x188   : > { %v1345_v51 = vmax.f32 %v1299_v22, 0.0  ;;  %v3223_v13 = vadd.f32 %v3222_v46, %v3221_v11  ;;  %v3224_v15 = vpop.f32.mrb[58].mxu0 }
 0x189   : > { %v3225_v17 = vpop.f32.mrb[59].mxu0 }
 0x18a   : > { %v3226_v8 = vadd.f32 %v3225_v17, %v3224_v15  ;;  %v1143_v19 = vadd.f32 %v3223_v13, %v4182_v36  ;;  %v1363_v20 = vpack.c.bf16 %v1345_v51, %v1344_v12 }
 0x18c   : > { %v1304_v16 = vadd.f32 %v4246_v39, %v1143_v19  ;;  %1706 = vmatmul.mubr.bf16.gmra.mrb[84].mxu1 %v1363_v20  ;;  %3474 = vmatmul.mubr.bf16.gmra.mrb[88].mxu0 %v1363_v20  ;;  %v1146_v14 = vadd.f32 %v3226_v8, %v4182_v36  ;;  %v4395_v8 = vadd.s32 16, %v4297_v45  ;;  %v4398_v19 = vadd.s32 24, %v4297_v45 }
 0x18d   : > { %1715 = vmatprep.mubr.bf16.mxu1 %v3832_v27 }
 0x18e   : > { %v1307_v21 = vadd.f32 %v4251_v43, %v1146_v14  ;;  %v3227_v23 = vpop.f32.mrb[60].mxu0  ;;  %v1346_v26 = vmax.f32 %v1304_v16, 0.0  ;;  %vm5082_vm11 = vcmp.eq.s32.totalorder %v4347_v2, %v4398_v19  ;;  %vm5101_vm5 = vcmp.eq.s32.totalorder %v4324_v25, %v4395_v8 }
 0x18f   : > { %v3228_v24 = vpop.f32.mrb[61].mxu0 }
 0x190   : > { %v1347_v44 = vmax.f32 %v1307_v21, 0.0  ;;  %v3229_v29 = vadd.f32 %v3228_v24, %v3227_v23  ;;  %v3230_v50 = vpop.f32.mrb[62].mxu0 }
 0x191   : > { %v3231_v30 = vpop.f32.mrb[63].mxu0 }
 0x192   : > { %v1364_v31 = vpack.c.bf16 %v1347_v44, %v1346_v26  ;;  %v1151_v34 = vadd.f32 %v3229_v29, %v4182_v36  ;;  %v3232_v35 = vadd.f32 %v3231_v30, %v3230_v50 }
 0x194   : > { %v1312_v39 = vadd.f32 %v4244_v37, %v1151_v34  ;;  %v1154_v38 = vadd.f32 %v3232_v35, %v4182_v36  ;;  %1716 = vmatmul.mubr.bf16.gmra.mrb[88].mxu1 %v1364_v31  ;;  %3477 = vmatprep.mubr.bf16.mxu0 %v1364_v31  ;;  %v1398_v36 = vld [vmem:[%s5063_s6] sm:$0x7]  ;;  %v1406_v37 = vsub.s32 1, %v4297_v45 }
 0x195   : > { %1725 = vmatprep.mubr.bf16.mxu1 %v3832_v27  ;;  %v4304_v27 = vrot.slane %v1398_v36, %v1402_v63  ;;  %v4322_v61 = vrot.slane %v1398_v36, %v1410_v47 }
 0x196   : > { %v1315_v43 = vadd.f32 %v4249_v42, %v1154_v38  ;;  %v1348_v28 = vmax.f32 %v1312_v39, 0.0  ;;  %v4306_v42 = vrot.slane %v1398_v36, %v1406_v37  ;;  %v4319_v56 = vrot.slane %v2034_v52, %v1406_v37 }
 0x197   : > { %v4336_v0 = vrot.slane %v2091_v32, %v1406_v37 }
 0x198   : > { %v1349_v40 = vmax.f32 %v1315_v43, 0.0  ;;  %vm5086_vm1 = vcmp.eq.s32.totalorder %v4319_v56, %v4297_v45  ;;  %vm5078_vm2 = vcmp.eq.s32.totalorder %v4319_v56, %v4317_v55  ;;  %vm5098_vm0 = vcmp.eq.s32.totalorder %v4319_v56, %v4395_v8 }
 0x199   : > { %vm3078_vm3 = vmpackc.low %vm5078_vm2, %vm5086_vm1  ;;  %vm5084_vm6 = vcmp.eq.s32.totalorder %v4336_v0, %v4297_v45  ;;  %vm5076_vm7 = vcmp.eq.s32.totalorder %v4336_v0, %v4317_v55  ;;  %vm5090_vm13 = vcmp.eq.s32.totalorder %v4336_v0, %v4395_v8  ;;  %vm5080_vm14 = vcmp.eq.s32.totalorder %v4336_v0, %v4398_v19 }
 0x19a   : > { %v1365_v41 = vpack.c.bf16 %v1349_v40, %v1348_v28  ;;  %vm3062_vm9 = vmpackc.low %vm5076_vm7, %vm5084_vm6  ;;  %vm5091_vm7 = vcmp.eq.s32.totalorder %v4347_v2, %v4395_v8 }
 0x19b   : > { %vm4415_vm15 = vmpackc.low %vm5080_vm14, %vm5090_vm13  ;;  %vm5083_vm14 = vcmp.eq.s32.totalorder %v4324_v25, %v4398_v19 }
 0x19c   : > { %1726 = vmatmul.mubr.bf16.gmra.mrb[92].mxu1 %v1365_v41  ;;  %3478 = vmatmul.mubr.bf16.gmra.mrb[92].mxu0 %v1365_v41  ;;  %vm4450_vm2 = vmpackc.low %vm5082_vm11, %vm5091_vm7 }
 0x19d   : > { %3079 = vmatprep.mubr.msk.bf16.mxu1 %vm3078_vm3, %v3833_v5  ;;  %3063 = vmatprep.mubr.msk.bf16.mxu0 %vm3062_vm9, %v3833_v5  ;;  %vm5081_vm3 = vcmp.eq.s32.totalorder %v4319_v56, %v4398_v19 }
 0x19e   : > { %vm4433_vm9 = vmpackc.low %vm5081_vm3, %vm5098_vm0 }
 0x19f   : > { %vm4465_vm3 = vmpackc.low %vm5083_vm14, %vm5101_vm5 }
 0x1f7   : > { %v1577_v4 = vpop.f32.mrb[32].mxu1 }
 0x1f8   : > { %v1578_v48 = vadd.f32 %v1577_v4, %v4304_v27  ;;  %v1579_v49 = vpop.f32.mrb[33].mxu1 }
 0x1f9   : > { %v1580_v53 = vadd.f32 %v1579_v49, %v4306_v42  ;;  %v1581_v54 = vpop.f32.mrb[34].mxu1  ;;  %v4474_v49 = vadd.s32 40, %v4297_v45 }
 0x1fa   : > { %v1897_v57 = vmax.f32 %v1578_v48, 0.0  ;;  %v1582_v58 = vadd.f32 %v1581_v54, %v4304_v27  ;;  %v1583_v59 = vpop.f32.mrb[35].mxu1  ;;  %v4471_v48 = vadd.s32 32, %v4297_v45 }
 0x1fb   : > { %v1898_v3 = vmax.f32 %v1580_v53, 0.0  ;;  %v1584_v60 = vadd.f32 %v1583_v59, %v4306_v42  ;;  %vm5089_vm14 = vcmp.eq.s32.totalorder %v4336_v0, %v4474_v49  ;;  %vm5093_vm1 = vcmp.eq.s32.totalorder %v4319_v56, %v4474_v49 }
 0x1fc   : > { %v1900_v62 = vmax.f32 %v1582_v58, 0.0  ;;  %vm5088_vm11 = vcmp.eq.s32.totalorder %v4336_v0, %v4471_v48  ;;  %vm5092_vm10 = vcmp.eq.s32.totalorder %v4319_v56, %v4471_v48  ;;  %vm5094_vm4 = vcmp.eq.s32.totalorder %v4347_v2, %v4471_v48 }
 0x1fd   : > { %1993 = vst [vmem:[%s3975_s21] sm:$0xff] %v1898_v3  ;;  %v1901_v1 = vmax.f32 %v1584_v60, 0.0  ;;  %vm4488_vm6 = vmpackc.low %vm5089_vm14, %vm5088_vm11  ;;  %vm5096_vm14 = vcmp.eq.s32.totalorder %v4347_v2, %v4474_v49  ;;  %vm5095_vm13 = vcmp.eq.s32.totalorder %v4324_v25, %v4471_v48  ;;  %vm5097_vm7 = vcmp.eq.s32.totalorder %v4324_v25, %v4474_v49  ;;  %v2351_v3 = vld [vmem:[#allocation3 + $0x8] sm:$0xff] }
 0x1fe   : > { %v4352_v6 = vpack.c.bf16 %v1900_v62, %v1897_v57  ;;  %vm4505_vm11 = vmpackc.low %vm5093_vm1, %vm5092_vm10 }
 0x1ff   : > { %1994 = vst [vmem:[%s3975_s21 + $0x8] sm:$0xff] %v1901_v1  ;;  %v1587_v9 = vpop.f32.mrb[36].mxu1  ;;  %v3451_v18 = vpop.f32.mrb[64].mxu0  ;;  %vm4523_vm10 = vmpackc.low %vm5096_vm14, %vm5094_vm4  ;;  %v5132_v1 = vmov 0 }
 0x200   : > { %v1588_v10 = vadd.f32 %v1587_v9, %v4304_v27  ;;  %v1779_v22 = vadd.f32 %v3451_v18, %v4322_v61  ;;  %v1589_v11 = vpop.f32.mrb[37].mxu1  ;;  %v1770_v46 = vpop.f32.mrb[65].mxu0  ;;  %v5133_v1 = vsel %vm4523_vm10, 4294967295, %v5132_v1  ;;  %vm4534_vm1 = vmpackc.low %vm5097_vm7, %vm5095_vm13 }
 0x201   : > { %v1590_v51 = vadd.f32 %v1589_v11, %v4306_v42  ;;  %v1771_v13 = vadd.f32 %v1770_v46, %v4322_v61  ;;  %v1591_v15 = vpop.f32.mrb[38].mxu1  ;;  %v3452_v17 = vpop.f32.mrb[66].mxu0 }
 0x202   : > { %v1903_v20 = vmax.f32 %v1588_v10, 0.0  ;;  %v1905_v16 = vmax.f32 %v1779_v22, 0.0  ;;  %v1592_v14 = vadd.f32 %v1591_v15, %v4304_v27  ;;  %v1782_v21 = vadd.f32 %v3452_v17, %v4322_v61  ;;  %v1593_v23 = vpop.f32.mrb[39].mxu1  ;;  %v1773_v24 = vpop.f32.mrb[67].mxu0 }
 0x203   : > { %v1904_v26 = vmax.f32 %v1590_v51, 0.0  ;;  %v1899_v44 = vmax.f32 %v1771_v13, 0.0  ;;  %v1594_v29 = vadd.f32 %v1593_v23, %v4306_v42  ;;  %v1774_v50 = vadd.f32 %v1773_v24, %v4322_v61 }
 0x204   : > { %v1906_v30 = vmax.f32 %v1592_v14, 0.0  ;;  %v1908_v31 = vmax.f32 %v1782_v21, 0.0  ;;  %v4546_v14 = vadd.s32 56, %v4297_v45 }
 0x205   : > { %1995 = vst [vmem:[%s3975_s21 + $0x10] sm:$0xff] %v1904_v26  ;;  %v1907_v34 = vmax.f32 %v1594_v29, 0.0  ;;  %v1902_v35 = vmax.f32 %v1774_v50, 0.0 }
 0x206   : > { %v4423_v38 = vpack.c.bf16 %v1906_v30, %v1903_v20  ;;  %v4425_v43 = vpack.c.bf16 %v1908_v31, %v1905_v16  ;;  %v4543_v16 = vadd.s32 48, %v4297_v45  ;;  %vm5100_vm13 = vcmp.eq.s32.totalorder %v4336_v0, %v4546_v14 }
 0x207   : > { %1996 = vst [vmem:[%s3975_s21 + $0x18] sm:$0xff] %v1907_v34  ;;  %v4442_v40 = vpack.c.bf16 %v1902_v35, %v1899_v44  ;;  %v1597_v41 = vpop.f32.mrb[40].mxu1  ;;  %vm5103_vm0 = vcmp.eq.s32.totalorder %v4319_v56, %v4546_v14  ;;  %vm5106_vm5 = vcmp.eq.s32.totalorder %v4347_v2, %v4546_v14 }
 0x208   : > { %v1598_v63 = vadd.f32 %v1597_v41, %v4304_v27  ;;  %v1599_v36 = vpop.f32.mrb[41].mxu1  ;;  %vm5099_vm4 = vcmp.eq.s32.totalorder %v4336_v0, %v4543_v16  ;;  %vm5102_vm7 = vcmp.eq.s32.totalorder %v4319_v56, %v4543_v16 }
 0x209   : > { %v1600_v47 = vadd.f32 %v1599_v36, %v4306_v42  ;;  %v1601_v4 = vpop.f32.mrb[42].mxu1  ;;  %vm4563_vm14 = vmpackc.low %vm5100_vm13, %vm5099_vm4  ;;  %vm5104_vm13 = vcmp.eq.s32.totalorder %v4347_v2, %v4543_v16 }
 0x20a   : > { %v1909_v52 = vmax.f32 %v1598_v63, 0.0  ;;  %v1602_v53 = vadd.f32 %v1601_v4, %v4304_v27  ;;  %v1603_v54 = vpop.f32.mrb[43].mxu1  ;;  %vm4581_vm4 = vmpackc.low %vm5103_vm0, %vm5102_vm7  ;;  %vm5105_vm0 = vcmp.eq.s32.totalorder %v4324_v25, %v4543_v16 }
 0x20b   : > { %v1910_v57 = vmax.f32 %v1600_v47, 0.0  ;;  %v1604_v58 = vadd.f32 %v1603_v54, %v4306_v42  ;;  %v5136_v47 = vmov 0  ;;  %vm4598_vm7 = vmpackc.low %vm5106_vm5, %vm5104_vm13  ;;  %vm5144_vm13 = vcmp.eq.s32.totalorder %v4324_v25, %v4395_v8 }
 0x20c   : > { %v1912_v59 = vmax.f32 %v1602_v53, 0.0  ;;  %v5137_v47 = vsel %vm4563_vm14, 4294967295, %v5136_v47  ;;  %vm5107_vm14 = vcmp.eq.s32.totalorder %v4324_v25, %v4546_v14  ;;  %vm5146_vm5 = vcmp.eq.s32.totalorder %v4347_v2, %v4395_v8  ;;  %v2354_v53 = vld [vmem:[#allocation3 + $0x20] sm:$0xff] }
 0x20d   : > { %1997 = vst [vmem:[%s3975_s21 + $0x20] sm:$0xff] %v1910_v57  ;;  %v1913_v60 = vmax.f32 %v1604_v58, 0.0  ;;  %vm4613_vm10 = vmpackc.low %vm5107_vm14, %vm5105_vm0  ;;  %vm5145_vm0 = vcmp.eq.s32.totalorder %v4319_v56, %v4395_v8  ;;  %vm5147_vm14 = vcmp.eq.s32.totalorder %v4336_v0, %v4395_v8 }
 0x20e   : > { %v4515_v62 = vpack.c.bf16 %v1912_v59, %v1909_v52 }
 0x20f   : > { %1998 = vst [vmem:[%s3975_s21 + $0x28] sm:$0xff] %v1913_v60  ;;  %v1607_v9 = vpop.f32.mrb[44].mxu1  ;;  %v3455_v18 = vpop.f32.mrb[68].mxu0 }
 0x210   : > { %v1608_v22 = vadd.f32 %v1607_v9, %v4304_v27  ;;  %v1795_v11 = vadd.f32 %v3455_v18, %v4322_v61  ;;  %v1609_v46 = vpop.f32.mrb[45].mxu1  ;;  %v1786_v51 = vpop.f32.mrb[69].mxu0 }
 0x211   : > { %v1610_v13 = vadd.f32 %v1609_v46, %v4306_v42  ;;  %v1787_v15 = vadd.f32 %v1786_v51, %v4322_v61  ;;  %v1611_v17 = vpop.f32.mrb[46].mxu1  ;;  %v3456_v20 = vpop.f32.mrb[70].mxu0 }
 0x212   : > { %v1915_v21 = vmax.f32 %v1608_v22, 0.0  ;;  %v1917_v23 = vmax.f32 %v1795_v11, 0.0  ;;  %v1612_v24 = vadd.f32 %v1611_v17, %v4304_v27  ;;  %v1798_v26 = vadd.f32 %v3456_v20, %v4322_v61  ;;  %v1613_v44 = vpop.f32.mrb[47].mxu1  ;;  %v1789_v29 = vpop.f32.mrb[71].mxu0 }
 0x213   : > { %v1916_v50 = vmax.f32 %v1610_v13, 0.0  ;;  %v1911_v30 = vmax.f32 %v1787_v15, 0.0  ;;  %v1614_v31 = vadd.f32 %v1613_v44, %v4306_v42  ;;  %v1790_v34 = vadd.f32 %v1789_v29, %v4322_v61 }
 0x214   : > { %v1918_v35 = vmax.f32 %v1612_v24, 0.0  ;;  %v1920_v41 = vmax.f32 %v1798_v26, 0.0  ;;  %v3834_v13 = vmov 0.0  }
 0x215   : > { %1999 = vst [vmem:[%s3975_s21 + $0x30] sm:$0xff] %v1916_v50  ;;  %v1919_v63 = vmax.f32 %v1614_v31, 0.0  ;;  %v1914_v36 = vmax.f32 %v1790_v34, 0.0  ;;  %v3034_v15 = vsel %vm5144_vm13, 1.0, %v3834_v13  ;;  %v3035_v17 = vsel %vm5145_vm0, 1.0, %v3834_v13 }
 0x216   : > { %v4571_v4 = vpack.c.bf16 %v1918_v35, %v1915_v21  ;;  %v4573_v52 = vpack.c.bf16 %v1920_v41, %v1917_v23  ;;  %v3050_v23 = vsel %vm5146_vm5, 1.0, %v3834_v13  ;;  %v3051_v24 = vsel %vm5147_vm14, 1.0, %v3834_v13 }
 0x217   : > { %2000 = vst [vmem:[%s3975_s21 + $0x38] sm:$0xff] %v1919_v63  ;;  %v4590_v54 = vpack.c.bf16 %v1914_v36, %v1911_v30  ;;  %v1617_v57 = vpop.f32.mrb[48].mxu1  ;;  %v2362_v44 = vadd.f32 %v3050_v23, %v3034_v15  ;;  %v2363_v29 = vadd.f32 %v3051_v24, %v3035_v17  ;;  %vm5148_vm13 = vcmp.eq.s32.totalorder %v4324_v25, %v4297_v45 }
 0x218   : > { %v1618_v59 = vadd.f32 %v1617_v57, %v4304_v27  ;;  %v1619_v60 = vpop.f32.mrb[49].mxu1  ;;  %v3030_v50 = vsel %vm5148_vm13, 1.0, %v3834_v13  ;;  %vm5149_vm0 = vcmp.eq.s32.totalorder %v4319_v56, %v4297_v45  ;;  %vm5150_vm5 = vcmp.eq.s32.totalorder %v4347_v2, %v4297_v45 }
 0x219   : > { %v1620_v18 = vadd.f32 %v1619_v60, %v4306_v42  ;;  %v1621_v22 = vpop.f32.mrb[50].mxu1  ;;  %v3031_v31 = vsel %vm5149_vm0, 1.0, %v3834_v13  ;;  %v3046_v8 = vsel %vm5150_vm5, 1.0, %v3834_v13  ;;  %vm5151_vm14 = vcmp.eq.s32.totalorder %v4336_v0, %v4297_v45 }
 0x21a   : > { %v1921_v11 = vmax.f32 %v1618_v59, 0.0  ;;  %v1622_v46 = vadd.f32 %v1621_v22, %v4304_v27  ;;  %v1623_v51 = vpop.f32.mrb[51].mxu1  ;;  %v3047_v34 = vsel %vm5151_vm14, 1.0, %v3834_v13  ;;  %v2380_v41 = vadd.f32 %v2363_v29, %v2362_v44 }
 0x21b   : > { %v1922_v20 = vmax.f32 %v1620_v18, 0.0  ;;  %v1624_v21 = vadd.f32 %v1623_v51, %v4306_v42  ;;  %v2358_v63 = vadd.f32 %v3046_v8, %v3030_v50  ;;  %v2359_v36 = vadd.f32 %v3047_v34, %v3031_v31 }
 0x21c   : > { %v1924_v26 = vmax.f32 %v1622_v46, 0.0  ;;  %vm5152_vm13 = vcmp.eq.s32.totalorder %v4324_v25, %v4398_v19  ;;  %vm5153_vm0 = vcmp.eq.s32.totalorder %v4319_v56, %v4398_v19  ;;  %vm5154_vm5 = vcmp.eq.s32.totalorder %v4347_v2, %v4398_v19  ;;  %2381 = vadd.xlane.f32.xlu1 %v2380_v41 }
 0x21d   : > { %2001 = vst [vmem:[%s3975_s21 + $0x40] sm:$0xff] %v1922_v20  ;;  %v1925_v30 = vmax.f32 %v1624_v21, 0.0  ;;  %v3036_v60 = vsel %vm5152_vm13, 1.0, %v3834_v13  ;;  %v3037_v18 = vsel %vm5153_vm0, 1.0, %v3834_v13  ;;  %v3052_v45 = vsel %vm5154_vm5, 1.0, %v3834_v13 }
 0x21e   : > { %v4653_v35 = vpack.c.bf16 %v1924_v26, %v1921_v11  ;;  %vm5155_vm14 = vcmp.eq.s32.totalorder %v4336_v0, %v4398_v19  ;;  %v2374_v17 = vadd.f32 %v2359_v36, %v2358_v63  ;;  %v2364_v20 = vadd.f32 %v3052_v45, %v3036_v60 }
 0x21f   : > { %2002 = vst [vmem:[%s3975_s21 + $0x48] sm:$0xff] %v1925_v30  ;;  %v1627_v57 = vpop.f32.mrb[52].mxu1  ;;  %v3459_v59 = vpop.f32.mrb[72].mxu0  ;;  %v3053_v22 = vsel %vm5155_vm14, 1.0, %v3834_v13  ;;  %vm5156_vm13 = vcmp.eq.s32.totalorder %v4324_v25, %v4317_v55  ;;  %vm5157_vm0 = vcmp.eq.s32.totalorder %v4319_v56, %v4317_v55  ;;  %vm5158_vm5 = vcmp.eq.s32.totalorder %v4347_v2, %v4317_v55 }
 0x220   : > { %v1628_v11 = vadd.f32 %v1627_v57, %v4304_v27  ;;  %v1811_v46 = vadd.f32 %v3459_v59, %v4322_v61  ;;  %v1629_v51 = vpop.f32.mrb[53].mxu1  ;;  %v1802_v15 = vpop.f32.mrb[73].mxu0  ;;  %v2365_v44 = vadd.f32 %v3053_v22, %v3037_v18  ;;  %v3032_v19 = vsel %vm5156_vm13, 1.0, %v3834_v13  ;;  %2375 = vadd.xlane.f32.xlu0 %v2374_v17 }
 0x221   : > { %v1630_v21 = vadd.f32 %v1629_v51, %v4306_v42  ;;  %v1803_v23 = vadd.f32 %v1802_v15, %v4322_v61  ;;  %v1631_v24 = vpop.f32.mrb[54].mxu1  ;;  %v3460_v26 = vpop.f32.mrb[74].mxu0  ;;  %v3033_v45 = vsel %vm5157_vm0, 1.0, %v3834_v13  ;;  %vm5159_vm14 = vcmp.eq.s32.totalorder %v4336_v0, %v4317_v55 }
 0x222   : > { %v1927_v29 = vmax.f32 %v1628_v11, 0.0  ;;  %v1929_v50 = vmax.f32 %v1811_v46, 0.0  ;;  %v1632_v30 = vadd.f32 %v1631_v24, %v4304_v27  ;;  %v1814_v31 = vadd.f32 %v3460_v26, %v4322_v61  ;;  %v1633_v8 = vpop.f32.mrb[55].mxu1  ;;  %v1805_v34 = vpop.f32.mrb[75].mxu0 }
 0x223   : > { %v1928_v41 = vmax.f32 %v1630_v21, 0.0  ;;  %v1923_v63 = vmax.f32 %v1803_v23, 0.0  ;;  %v1634_v36 = vadd.f32 %v1633_v8, %v4306_v42  ;;  %v1806_v57 = vadd.f32 %v1805_v34, %v4322_v61 }
 0x224   : > { %v1930_v59 = vmax.f32 %v1632_v30, 0.0  ;;  %v1932_v60 = vmax.f32 %v1814_v31, 0.0  ;;  %v2383_v18 = vadd.f32 %v2365_v44, %v2364_v20  ;;  %v3048_v46 = vsel %vm5158_vm5, 1.0, %v3834_v13 }
 0x225   : > { %2003 = vst [vmem:[%s3975_s21 + $0x50] sm:$0xff] %v1928_v41  ;;  %v1931_v22 = vmax.f32 %v1634_v36, 0.0  ;;  %v1926_v11 = vmax.f32 %v1806_v57, 0.0  ;;  %v3049_v51 = vsel %vm5159_vm14, 1.0, %v3834_v13  ;;  %v2360_v20 = vadd.f32 %v3048_v46, %v3032_v19 }
 0x226   : > { %v4697_v15 = vpack.c.bf16 %v1930_v59, %v1927_v29  ;;  %v4699_v17 = vpack.c.bf16 %v1932_v60, %v1929_v50  ;;  %2384 = vadd.xlane.f32.xlu1 %v2383_v18  ;;  %v2361_v21 = vadd.f32 %v3049_v51, %v3033_v45  ;;  %vm5160_vm13 = vcmp.eq.s32.totalorder %v4324_v25, %v4474_v49 }
 0x227   : > { %2004 = vst [vmem:[%s3975_s21 + $0x58] sm:$0xff] %v1931_v22  ;;  %v4702_v23 = vpack.c.bf16 %v1926_v11, %v1923_v63  ;;  %v1637_v24 = vpop.f32.mrb[56].mxu1  ;;  %v3040_v26 = vsel %vm5160_vm13, 1.0, %v3834_v13  ;;  %vm5161_vm0 = vcmp.eq.s32.totalorder %v4319_v56, %v4474_v49  ;;  %vm5162_vm5 = vcmp.eq.s32.totalorder %v4347_v2, %v4474_v49 }
 0x228   : > { %v3041_v55 = vsel %vm5161_vm0, 1.0, %v3834_v13  ;;  %v3056_v44 = vsel %vm5162_vm5, 1.0, %v3834_v13  ;;  %v1638_v19 = vadd.f32 %v1637_v24, %v4304_v27  ;;  %v1639_v29 = vpop.f32.mrb[57].mxu1  ;;  %v2377_v50 = vadd.f32 %v2361_v21, %v2360_v20 }
 0x229   : > { %vm5163_vm14 = vcmp.eq.s32.totalorder %v4336_v0, %v4474_v49  ;;  %v2368_v31 = vadd.f32 %v3056_v44, %v3040_v26  ;;  %v1640_v8 = vadd.f32 %v1639_v29, %v4306_v42  ;;  %v1641_v34 = vpop.f32.mrb[58].mxu1  ;;  %vm5164_vm13 = vcmp.eq.s32.totalorder %v4324_v25, %v4471_v48 }
 0x22a   : > { %v3057_v30 = vsel %vm5163_vm14, 1.0, %v3834_v13  ;;  %v3038_v63 = vsel %vm5164_vm13, 1.0, %v3834_v13  ;;  %vm5165_vm0 = vcmp.eq.s32.totalorder %v4319_v56, %v4471_v48  ;;  %v1933_v57 = vmax.f32 %v1638_v19, 0.0  ;;  %v1643_v59 = vpop.f32.mrb[59].mxu1  ;;  %2378 = vadd.xlane.f32.xlu0 %v2377_v50 }
 0x22b   : > { %v2369_v41 = vadd.f32 %v3057_v30, %v3041_v55  ;;  %v3039_v36 = vsel %vm5165_vm0, 1.0, %v3834_v13  ;;  %v1642_v49 = vadd.f32 %v1641_v34, %v4304_v27  ;;  %vm5166_vm5 = vcmp.eq.s32.totalorder %v4347_v2, %v4471_v48 }
 0x22c   : > { %v3054_v60 = vsel %vm5166_vm5, 1.0, %v3834_v13  ;;  %vm5167_vm14 = vcmp.eq.s32.totalorder %v4336_v0, %v4471_v48  ;;  %v1934_v45 = vmax.f32 %v1640_v8, 0.0  ;;  %v1644_v22 = vadd.f32 %v1643_v59, %v4306_v42 }
 0x22d   : > { %v3055_v18 = vsel %vm5167_vm14, 1.0, %v3834_v13  ;;  %v2389_v11 = vadd.f32 %v2369_v41, %v2368_v31  ;;  %v2366_v46 = vadd.f32 %v3054_v60, %v3038_v63  ;;  %v1936_v51 = vmax.f32 %v1642_v49, 0.0 }
 0x22e   : > { %v2367_v20 = vadd.f32 %v3055_v18, %v3039_v36  ;;  %vm5168_vm13 = vcmp.eq.s32.totalorder %v4324_v25, %v4546_v14  ;;  %vm5169_vm0 = vcmp.eq.s32.totalorder %v4319_v56, %v4546_v14  ;;  %2005 = vst [vmem:[%s3975_s21 + $0x60] sm:$0xff] %v1934_v45  ;;  %v1937_v48 = vmax.f32 %v1644_v22, 0.0 }
 0x22f   : > { %v3044_v21 = vsel %vm5168_vm13, 1.0, %v3834_v13  ;;  %v3045_v24 = vsel %vm5169_vm0, 1.0, %v3834_v13  ;;  %2390 = vadd.xlane.f32.xlu1 %v2389_v11  ;;  %vm5170_vm5 = vcmp.eq.s32.totalorder %v4347_v2, %v4546_v14  ;;  %vm5171_vm14 = vcmp.eq.s32.totalorder %v4336_v0, %v4546_v14  ;;  %v1647_v31 = vpop.f32.mrb[60].mxu1  ;;  %v3463_v8 = vpop.f32.mrb[76].mxu0 }
 0x230   : > { %v3060_v26 = vsel %vm5170_vm5, 1.0, %v3834_v13  ;;  %v3061_v55 = vsel %vm5171_vm14, 1.0, %v3834_v13  ;;  %vm5172_vm13 = vcmp.eq.s32.totalorder %v4324_v25, %v4543_v16  ;;  %v4761_v19 = vpack.c.bf16 %v1936_v51, %v1933_v57  ;;  %2006 = vst [vmem:[%s3975_s21 + $0x68] sm:$0xff] %v1937_v48  ;;  %v1649_v36 = vpop.f32.mrb[61].mxu1  ;;  %v1818_v57 = vpop.f32.mrb[77].mxu0 }
 0x231   : > { %v3042_v44 = vsel %vm5172_vm13, 1.0, %v3834_v13  ;;  %v2386_v29 = vadd.f32 %v2367_v20, %v2366_v46  ;;  %v2372_v50 = vadd.f32 %v3060_v26, %v3044_v21  ;;  %v2373_v30 = vadd.f32 %v3061_v55, %v3045_v24  ;;  %v3464_v18 = vpop.f32.mrb[78].mxu0 }
 0x232   : > { %vm5173_vm0 = vcmp.eq.s32.totalorder %v4319_v56, %v4543_v16  ;;  %vm5174_vm5 = vcmp.eq.s32.totalorder %v4347_v2, %v4543_v16  ;;  %vm5175_vm14 = vcmp.eq.s32.totalorder %v4336_v0, %v4543_v16  ;;  %v1648_v41 = vadd.f32 %v1647_v31, %v4304_v27  ;;  %v1651_v2 = vpop.f32.mrb[62].mxu1  ;;  %v1821_v22 = vpop.f32.mrb[79].mxu0 }
 0x233   : > { %v3043_v34 = vsel %vm5173_vm0, 1.0, %v3834_v13  ;;  %v3058_v14 = vsel %vm5174_vm5, 1.0, %v3834_v13  ;;  %v3059_v25 = vsel %vm5175_vm14, 1.0, %v3834_v13  ;;  %v1827_v63 = vadd.f32 %v3463_v8, %v4322_v61  ;;  %2387 = vadd.xlane.f32.xlu0 %v2386_v29  ;;  %v1653_v13 = vpop.f32.mrb[63].mxu1 }
 0x234   : > { %v2395_v49 = vadd.f32 %v2373_v30, %v2372_v50  ;;  %v2370_v56 = vadd.f32 %v3058_v14, %v3042_v44  ;;  %v1650_v59 = vadd.f32 %v1649_v36, %v4306_v42  ;;  %v1819_v60 = vadd.f32 %v1818_v57, %v4322_v61 }
 0x235   : > { %v2371_v45 = vadd.f32 %v3059_v25, %v3043_v34  ;;  %v1652_v0 = vadd.f32 %v1651_v2, %v4304_v27  ;;  %v1830_v16 = vadd.f32 %v3464_v18, %v4322_v61  ;;  %v1939_v11 = vmax.f32 %v1648_v41, 0.0 }
 0x236   : > { %2396 = vadd.xlane.f32.xlu1 %v2395_v49  ;;  %v1940_v46 = vmax.f32 %v1650_v59, 0.0  ;;  %v1654_v51 = vadd.f32 %v1653_v13, %v4306_v42  ;;  %v1822_v20 = vadd.f32 %v1821_v22, %v4322_v61  ;;  %v1941_v21 = vmax.f32 %v1827_v63, 0.0 }
 0x237   : > { %v1942_v24 = vmax.f32 %v1652_v0, 0.0  ;;  %v1944_v48 = vmax.f32 %v1830_v16, 0.0  ;;  %v2392_v26 = vadd.f32 %v2371_v45, %v2370_v56  ;;  %v1935_v55 = vmax.f32 %v1819_v60, 0.0  ;;  %v1657_v8 = vpop.f32.mrb[64].mxu1 }
 0x238   : > { %2007 = vst [vmem:[%s3975_s21 + $0x70] sm:$0xff] %v1940_v46  ;;  %v1943_v44 = vmax.f32 %v1654_v51, 0.0  ;;  %v1938_v29 = vmax.f32 %v1822_v20, 0.0  ;;  %v1658_v34 = vadd.f32 %v1657_v8, %v4304_v27  ;;  %v1659_v14 = vpop.f32.mrb[65].mxu1 }
 0x239   : > { %v4785_v50 = vpack.c.bf16 %v1942_v24, %v1939_v11  ;;  %v4787_v30 = vpack.c.bf16 %v1944_v48, %v1941_v21  ;;  %2393 = vadd.xlane.f32.xlu0 %v2392_v26  ;;  %v1660_v25 = vadd.f32 %v1659_v14, %v4306_v42  ;;  %v1661_v41 = vpop.f32.mrb[66].mxu1 }
 0x23a   : > { %2008 = vst [vmem:[%s3975_s21 + $0x78] sm:$0xff] %v1943_v44  ;;  %v4790_v31 = vpack.c.bf16 %v1938_v29, %v1935_v55  ;;  %v1662_v63 = vadd.f32 %v1661_v41, %v4304_v27  ;;  %v1663_v36 = vpop.f32.mrb[67].mxu1  ;;  %v1945_v56 = vmax.f32 %v1658_v34, 0.0 }
 0x23b   : > { %v1946_v57 = vmax.f32 %v1660_v25, 0.0  ;;  %v1664_v49 = vadd.f32 %v1663_v36, %v4306_v42 }
 0x23c   : > { %v1948_v59 = vmax.f32 %v1662_v63, 0.0 }
 0x23d   : > { %2009 = vst [vmem:[%s3975_s21 + $0x80] sm:$0xff] %v1946_v57  ;;  %v1949_v60 = vmax.f32 %v1664_v49, 0.0 }
 0x23e   : > { %v2172_v2 = vpack.c.bf16 %v1948_v59, %v1945_v56 }
 0x23f   : > { %2010 = vst [vmem:[%s3975_s21 + $0x88] sm:$0xff] %v1949_v60  ;;  %v1667_v18 = vpop.f32.mrb[68].mxu1  ;;  %v3467_v45 = vpop.f32.mrb[80].mxu0 }
 0x240   : > { %v1668_v0 = vadd.f32 %v1667_v18, %v4304_v27  ;;  %v1843_v16 = vadd.f32 %v3467_v45, %v4322_v61  ;;  %v1669_v13 = vpop.f32.mrb[69].mxu1  ;;  %v1834_v22 = vpop.f32.mrb[81].mxu0  ;;  %3321 = vmatprep.subr.bf16.mxu1 %v2172_v2 }
 0x241   : > { %v1670_v11 = vadd.f32 %v1669_v13, %v4306_v42  ;;  %v1835_v46 = vadd.f32 %v1834_v22, %v4322_v61  ;;  %v1671_v51 = vpop.f32.mrb[70].mxu1  ;;  %v3468_v20 = vpop.f32.mrb[82].mxu0  ;;  %3322 = vmatpush3.bf16.msra.mxu1 %v4352_v6 }
 0x242   : > { %v1672_v21 = vadd.f32 %v1671_v51, %v4304_v27  ;;  %v1846_v24 = vadd.f32 %v3468_v20, %v4322_v61  ;;  %v1673_v48 = vpop.f32.mrb[71].mxu1  ;;  %v1837_v26 = vpop.f32.mrb[83].mxu0  ;;  %v1951_v8 = vmax.f32 %v1668_v0, 0.0  ;;  %v1953_v34 = vmax.f32 %v1843_v16, 0.0 }
 0x243   : > { %v1952_v55 = vmax.f32 %v1670_v11, 0.0  ;;  %v1674_v44 = vadd.f32 %v1673_v48, %v4306_v42  ;;  %v1838_v29 = vadd.f32 %v1837_v26, %v4322_v61  ;;  %v1947_v41 = vmax.f32 %v1835_v46, 0.0 }
 0x244   : > { %v1954_v14 = vmax.f32 %v1672_v21, 0.0  ;;  %v1956_v25 = vmax.f32 %v1846_v24, 0.0 }
 0x245   : > { %2011 = vst [vmem:[%s3975_s21 + $0x90] sm:$0xff] %v1952_v55  ;;  %v1955_v63 = vmax.f32 %v1674_v44, 0.0  ;;  %v1950_v6 = vmax.f32 %v1838_v29, 0.0 }
 0x246   : > { %v2173_v36 = vpack.c.bf16 %v1954_v14, %v1951_v8  ;;  %v2197_v57 = vpack.c.bf16 %v1956_v25, %v1953_v34 }
 0x247   : > { %2012 = vst [vmem:[%s3975_s21 + $0x98] sm:$0xff] %v1955_v63  ;;  %v2196_v49 = vpack.c.bf16 %v1950_v6, %v1947_v41  ;;  %v1677_v56 = vpop.f32.mrb[72].mxu1 }
 0x248   : > { %v1678_v59 = vadd.f32 %v1677_v56, %v4304_v27  ;;  %v1679_v60 = vpop.f32.mrb[73].mxu1  ;;  %3323 = vmatprep.subr.bf16.mxu1 %v2173_v36 }
 0x249   : > { %v1680_v2 = vadd.f32 %v1679_v60, %v4306_v42  ;;  %v1681_v18 = vpop.f32.mrb[74].mxu1  ;;  %3281 = vmatprep.subr.bf16.mxu0 %v2196_v49  ;;  %3324 = vmatpush3.bf16.msra.mxu1 %v4423_v38 }
 0x24a   : > { %v1682_v45 = vadd.f32 %v1681_v18, %v4304_v27  ;;  %3282 = vmatpush3.bf16.msra.mxu0 %v4442_v40  ;;  %v1683_v0 = vpop.f32.mrb[75].mxu1  ;;  %v1957_v22 = vmax.f32 %v1678_v59, 0.0 }
 0x24b   : > { %v1958_v16 = vmax.f32 %v1680_v2, 0.0  ;;  %3283 = vmatprep.subr.bf16.mxu0 %v2197_v57  ;;  %v1684_v13 = vadd.f32 %v1683_v0, %v4306_v42 }
 0x24c   : > { %v1960_v11 = vmax.f32 %v1682_v45, 0.0 }
 0x24d   : > { %2013 = vst [vmem:[%s3975_s21 + $0xa0] sm:$0xff] %v1958_v16  ;;  %v1961_v46 = vmax.f32 %v1684_v13, 0.0 }
 0x24e   : > { %v2174_v51 = vpack.c.bf16 %v1960_v11, %v1957_v22  ;;  %3284 = vmatpush3.bf16.msra.mxu0 %v4425_v43 }
 0x24f   : > { %2014 = vst [vmem:[%s3975_s21 + $0xa8] sm:$0xff] %v1961_v46  ;;  %v1687_v20 = vpop.f32.mrb[76].mxu1  ;;  %v3471_v21 = vpop.f32.mrb[84].mxu0 }
 0x250   : > { %v1688_v38 = vadd.f32 %v1687_v20, %v4304_v27  ;;  %v1859_v24 = vadd.f32 %v3471_v21, %v4322_v61  ;;  %v1689_v40 = vpop.f32.mrb[77].mxu1  ;;  %v1850_v48 = vpop.f32.mrb[85].mxu0  ;;  %3325 = vmatprep.subr.bf16.mxu1 %v2174_v51 }
 0x251   : > { %v1690_v26 = vadd.f32 %v1689_v40, %v4306_v42  ;;  %v1851_v55 = vadd.f32 %v1850_v48, %v4322_v61  ;;  %v1691_v44 = vpop.f32.mrb[78].mxu1  ;;  %v3472_v29 = vpop.f32.mrb[86].mxu0  ;;  %3326 = vmatpush3.bf16.msra.mxu1 %v4515_v62 }
 0x252   : > { %v1692_v43 = vadd.f32 %v1691_v44, %v4304_v27  ;;  %v1862_v8 = vadd.f32 %v3472_v29, %v4322_v61  ;;  %v1853_v34 = vpop.f32.mrb[87].mxu0  ;;  %v1693_v14 = vpop.f32.mrb[79].mxu1  ;;  %v1963_v6 = vmax.f32 %v1688_v38, 0.0  ;;  %v1965_v36 = vmax.f32 %v1859_v24, 0.0 }
 0x253   : > { %v1964_v25 = vmax.f32 %v1690_v26, 0.0  ;;  %v1854_v41 = vadd.f32 %v1853_v34, %v4322_v61  ;;  %v1694_v63 = vadd.f32 %v1693_v14, %v4306_v42  ;;  %v1959_v56 = vmax.f32 %v1851_v55, 0.0 }
 0x254   : > { %v1966_v57 = vmax.f32 %v1692_v43, 0.0  ;;  %v1968_v49 = vmax.f32 %v1862_v8, 0.0 }
 0x255   : > { %2015 = vst [vmem:[%s3975_s21 + $0xb0] sm:$0xff] %v1964_v25  ;;  %v1962_v59 = vmax.f32 %v1854_v41, 0.0  ;;  %v1967_v62 = vmax.f32 %v1694_v63, 0.0 }
 0x256   : > { %v2175_v60 = vpack.c.bf16 %v1966_v57, %v1963_v6  ;;  %v2199_v2 = vpack.c.bf16 %v1968_v49, %v1965_v36 }
 0x257   : > { %v2198_v18 = vpack.c.bf16 %v1962_v59, %v1959_v56  ;;  %2016 = vst [vmem:[%s3975_s21 + $0xb8] sm:$0xff] %v1967_v62  ;;  %v1697_v45 = vpop.f32.mrb[80].mxu1 }
 0x258   : > { %v1698_v0 = vadd.f32 %v1697_v45, %v4304_v27  ;;  %v1699_v16 = vpop.f32.mrb[81].mxu1  ;;  %3327 = vmatprep.subr.bf16.mxu1 %v2175_v60 }
 0x259   : > { %v1700_v13 = vadd.f32 %v1699_v16, %v4306_v42  ;;  %v1701_v22 = vpop.f32.mrb[82].mxu1  ;;  %3285 = vmatprep.subr.bf16.mxu0 %v2198_v18  ;;  %3328 = vmatpush3.bf16.msra.mxu1 %v4571_v4 }
 0x25a   : > { %v1702_v11 = vadd.f32 %v1701_v22, %v4304_v27  ;;  %3286 = vmatpush3.bf16.msra.mxu0 %v4590_v54  ;;  %v1703_v46 = vpop.f32.mrb[83].mxu1  ;;  %v1969_v21 = vmax.f32 %v1698_v0, 0.0 }
 0x25b   : > { %v1970_v51 = vmax.f32 %v1700_v13, 0.0  ;;  %3287 = vmatprep.subr.bf16.mxu0 %v2199_v2  ;;  %v1704_v20 = vadd.f32 %v1703_v46, %v4306_v42 }
 0x25c   : > { %v1972_v38 = vmax.f32 %v1702_v11, 0.0 }
 0x25d   : > { %2017 = vst [vmem:[%s3975_s21 + $0xc0] sm:$0xff] %v1970_v51  ;;  %v1973_v24 = vmax.f32 %v1704_v20, 0.0 }
 0x25e   : > { %v2176_v40 = vpack.c.bf16 %v1972_v38, %v1969_v21  ;;  %3288 = vmatpush3.bf16.msra.mxu0 %v4573_v52 }
 0x25f   : > { %2018 = vst [vmem:[%s3975_s21 + $0xc8] sm:$0xff] %v1973_v24  ;;  %v1707_v48 = vpop.f32.mrb[84].mxu1  ;;  %v3475_v26 = vpop.f32.mrb[88].mxu0 }
 0x260   : > { %v1708_v4 = vadd.f32 %v1707_v48, %v4304_v27  ;;  %v1875_v55 = vadd.f32 %v3475_v26, %v4322_v61  ;;  %v1709_v54 = vpop.f32.mrb[85].mxu1  ;;  %v1866_v44 = vpop.f32.mrb[89].mxu0  ;;  %3329 = vmatprep.subr.bf16.mxu1 %v2176_v40 }
 0x261   : > { %v1710_v29 = vadd.f32 %v1709_v54, %v4306_v42  ;;  %v1867_v43 = vadd.f32 %v1866_v44, %v4322_v61  ;;  %v1711_v8 = vpop.f32.mrb[86].mxu1  ;;  %v3476_v34 = vpop.f32.mrb[90].mxu0  ;;  %3330 = vmatpush3.bf16.msra.mxu1 %v4653_v35 }
 0x262   : > { %v1712_v52 = vadd.f32 %v1711_v8, %v4304_v27  ;;  %v1878_v14 = vadd.f32 %v3476_v34, %v4322_v61  ;;  %v1869_v25 = vpop.f32.mrb[91].mxu0  ;;  %v1713_v41 = vpop.f32.mrb[87].mxu1  ;;  %v1975_v57 = vmax.f32 %v1708_v4, 0.0  ;;  %v1977_v49 = vmax.f32 %v1875_v55, 0.0 }
 0x263   : > { %v1976_v63 = vmax.f32 %v1710_v29, 0.0  ;;  %v1870_v6 = vadd.f32 %v1869_v25, %v4322_v61  ;;  %v1714_v36 = vadd.f32 %v1713_v41, %v4306_v42  ;;  %v1971_v62 = vmax.f32 %v1867_v43, 0.0 }
 0x264   : > { %v1978_v56 = vmax.f32 %v1712_v52, 0.0  ;;  %v1980_v59 = vmax.f32 %v1878_v14, 0.0 }
 0x265   : > { %2019 = vst [vmem:[%s3975_s21 + $0xd0] sm:$0xff] %v1976_v63  ;;  %v1974_v60 = vmax.f32 %v1870_v6, 0.0  ;;  %v1979_v35 = vmax.f32 %v1714_v36, 0.0 }
 0x266   : > { %v2177_v2 = vpack.c.bf16 %v1978_v56, %v1975_v57  ;;  %v2201_v18 = vpack.c.bf16 %v1980_v59, %v1977_v49 }
 0x267   : > { %v2200_v45 = vpack.c.bf16 %v1974_v60, %v1971_v62  ;;  %2020 = vst [vmem:[%s3975_s21 + $0xd8] sm:$0xff] %v1979_v35  ;;  %v1717_v0 = vpop.f32.mrb[88].mxu1  ;;  %v2356_v35 = vld [vmem:[#allocation3 + $0x30] sm:$0xff] }
 0x268   : > { %v1718_v16 = vadd.f32 %v1717_v0, %v4304_v27  ;;  %v1719_v13 = vpop.f32.mrb[89].mxu1  ;;  %3331 = vmatprep.subr.bf16.mxu1 %v2177_v2 }
 0x269   : > { %v1720_v22 = vadd.f32 %v1719_v13, %v4306_v42  ;;  %v1721_v11 = vpop.f32.mrb[90].mxu1  ;;  %3289 = vmatprep.subr.bf16.mxu0 %v2200_v45  ;;  %3332 = vmatpush3.bf16.msra.mxu1 %v4697_v15 }
 0x26a   : > { %v1722_v46 = vadd.f32 %v1721_v11, %v4304_v27  ;;  %3290 = vmatpush3.bf16.msra.mxu0 %v4702_v23  ;;  %v1723_v51 = vpop.f32.mrb[91].mxu1  ;;  %v1981_v38 = vmax.f32 %v1718_v16, 0.0 }
 0x26b   : > { %v1982_v20 = vmax.f32 %v1720_v22, 0.0  ;;  %3291 = vmatprep.subr.bf16.mxu0 %v2201_v18  ;;  %v1724_v21 = vadd.f32 %v1723_v51, %v4306_v42 }
 0x26c   : > { %v1984_v24 = vmax.f32 %v1722_v46, 0.0 }
 0x26d   : > { %2021 = vst [vmem:[%s3975_s21 + $0xe0] sm:$0xff] %v1982_v20  ;;  %v1985_v40 = vmax.f32 %v1724_v21, 0.0 }
 0x26e   : > { %v2178_v48 = vpack.c.bf16 %v1984_v24, %v1981_v38  ;;  %3292 = vmatpush3.bf16.msra.mxu0 %v4699_v17  ;;  %v2148_v24 = vld [vmem:[#allocation2] sm:$0xff] }
 0x26f   : > { %2022 = vst [vmem:[%s3975_s21 + $0xe8] sm:$0xff] %v1985_v40  ;;  %v1727_v26 = vpop.f32.mrb[92].mxu1  ;;  %v3479_v4 = vpop.f32.mrb[92].mxu0 }
 0x270   : > { %v1728_v15 = vadd.f32 %v1727_v26, %v4304_v27  ;;  %v1891_v55 = vadd.f32 %v3479_v4, %v4322_v61  ;;  %v1729_v23 = vpop.f32.mrb[93].mxu1  ;;  %v1882_v54 = vpop.f32.mrb[93].mxu0  ;;  %3333 = vmatprep.subr.bf16.mxu1 %v2178_v48 }
 0x271   : > { %v1730_v44 = vadd.f32 %v1729_v23, %v4306_v42  ;;  %v1883_v29 = vadd.f32 %v1882_v54, %v4322_v61  ;;  %v1731_v43 = vpop.f32.mrb[94].mxu1  ;;  %v3480_v8 = vpop.f32.mrb[94].mxu0  ;;  %3334 = vmatpush3.bf16.msra.mxu1 %v4761_v19 }
 0x272   : > { %v1732_v17 = vadd.f32 %v1731_v43, %v4304_v27  ;;  %v1894_v34 = vadd.f32 %v3480_v8, %v4322_v61  ;;  %v1885_v52 = vpop.f32.mrb[95].mxu0  ;;  %v1733_v14 = vpop.f32.mrb[95].mxu1  ;;  %v1987_v6 = vmax.f32 %v1728_v15, 0.0  ;;  %v1989_v36 = vmax.f32 %v1891_v55, 0.0  ;;  %v2149_v55 = vld [vmem:[#allocation2 + $0x8] sm:$0xff] }
 0x273   : > { %v1988_v25 = vmax.f32 %v1730_v44, 0.0  ;;  %v1886_v41 = vadd.f32 %v1885_v52, %v4322_v61  ;;  %v1734_v63 = vadd.f32 %v1733_v14, %v4306_v42  ;;  %v1983_v56 = vmax.f32 %v1883_v29, 0.0  ;;  %v2352_v42 = vld [vmem:[#allocation3 + $0x10] sm:$0xff] }
 0x274   : > { %v1990_v57 = vmax.f32 %v1732_v17, 0.0  ;;  %v1992_v49 = vmax.f32 %v1894_v34, 0.0 }
 0x275   : > { %2023 = vst [vmem:[%s3975_s21 + $0xf0] sm:$0xff] %v1988_v25  ;;  %v1986_v59 = vmax.f32 %v1886_v41, 0.0  ;;  %v1991_v19 = vmax.f32 %v1734_v63, 0.0  ;;  %v2150_v41 = vld [vmem:[#allocation2 + $0x10] sm:$0xff] }
 0x276   : > { %v2179_v62 = vpack.c.bf16 %v1990_v57, %v1987_v6  ;;  %v2203_v27 = vpack.c.bf16 %v1992_v49, %v1989_v36 }
 0x277   : > { %v2202_v60 = vpack.c.bf16 %v1986_v59, %v1983_v56  ;;  %2024 = vst [vmem:[%s3975_s21 + $0xf8] sm:$0xff] %v1991_v19  ;;  %v2151_v56 = vld [vmem:[#allocation2 + $0x18] sm:$0xff] }
 0x278   : > { %3335 = vmatprep.subr.bf16.mxu1 %v2179_v62 }
 0x279   : > { %3293 = vmatprep.subr.bf16.mxu0 %v2202_v60  ;;  %3336 = vmatpush3.bf16.msra.mxu1 %v4785_v50 }
 0x27a   : > { %3294 = vmatpush3.bf16.msra.mxu0 %v4790_v31 }
 0x27b   : > { %3295 = vmatprep.subr.bf16.mxu0 %v2203_v27 }
 0x27c   : > { %3081 = vmatmul.mubr.msk.bf16.vlgmr.msra.gmra.mrb[96].mxu1 %vm4364_vm8, %v3833_v5  ;;  %vm5176_vm8 = vnez %v5133_v1 }
 0x27d   : > { %3083 = vmatprep.mubr.msk.bf16.mxu1 %vm4433_vm9, %v3833_v5 }
 0x27e   : > { %3296 = vmatpush3.bf16.msra.mxu0 %v4787_v30  ;;  %v2357_v30 = vld [vmem:[#allocation3 + $0x38] sm:$0xff] }
 0x281   : > { %3065 = vmatmul.mubr.msk.bf16.vlgmr.msra.gmra.mrb[96].mxu0 %vm4388_vm12, %v3833_v5 }
 0x282   : > { %3067 = vmatprep.mubr.msk.bf16.mxu0 %vm4415_vm15, %v3833_v5 }
 0x284   : > { %3085 = vmatmul.mubr.msk.bf16.gmra.mrb[100].mxu1 %vm4465_vm3, %v3833_v5 }
 0x285   : > { %3087 = vmatprep.mubr.msk.bf16.mxu1 %vm4505_vm11, %v3833_v5  ;;  %vm5177_vm11 = vnez %v5137_v47 }
 0x289   : > { %3069 = vmatmul.mubr.msk.bf16.gmra.mrb[100].mxu0 %vm4450_vm2, %v3833_v5 }
 0x28a   : > { %3071 = vmatprep.mubr.msk.bf16.mxu0 %vm4488_vm6, %v3833_v5 }
 0x28c   : > { %3089 = vmatmul.mubr.msk.bf16.gmra.mrb[104].mxu1 %vm4534_vm1, %v3833_v5  ;;  %vm2406_vm1 = vcmask 7168  }
 0x28d   : > { %3091 = vmatprep.mubr.msk.bf16.mxu1 %vm4581_vm4, %v3833_v5 }
 0x291   : > { %3073 = vmatmul.mubr.msk.bf16.gmra.mrb[104].mxu0 %vm5176_vm8, %v3833_v5 }
 0x292   : > { %3075 = vmatprep.mubr.msk.bf16.mxu0 %vm5177_vm11, %v3833_v5 }
 0x294   : > { %3093 = vmatmul.mubr.msk.bf16.gmra.mrb[108].mxu1 %vm4613_vm10, %v3833_v5 }
 0x299   : > { %3077 = vmatmul.mubr.msk.bf16.gmra.mrb[108].mxu0 %vm4598_vm7, %v3833_v5  ;;  %v2355_v5 = vld [vmem:[#allocation3 + $0x28] sm:$0xff] }
 0x2a9   : > { %v2382_v61 = vpop.xlane.xlu1 %2381 }
 0x2aa   : > { %v2400_v39 = vadd.f32 %v2382_v61, %v2352_v42 }
 0x2ac   : > { %2409 = vst.msk [vmem:[#allocation3 + $0x10] sm:$0xff] %vm2406_vm1, %v2400_v39 }
 0x2ad   : > { %v2376_v12 = vpop.xlane.xlu0 %2375 }
 0x2ae   : > { %v2398_v28 = vadd.f32 %v2376_v12, %v2350_v7 }
 0x2b0   : > { %2407 = vst.msk [vmem:[#allocation3] sm:$0xff] %vm2406_vm1, %v2398_v28 }
 0x2b3   : > { %v2385_v37 = vpop.xlane.xlu1 %2384 }
 0x2b4   : > { %v2401_v1 = vadd.f32 %v2385_v37, %v2353_v33  ;;  %v2152_v33 = vld [vmem:[#allocation2 + $0x20] sm:$0xff] }
 0x2b6   : > { %2410 = vst.msk [vmem:[#allocation3 + $0x18] sm:$0xff] %vm2406_vm1, %v2401_v1 }
 0x2b7   : > { %v2379_v32 = vpop.xlane.xlu0 %2378 }
 0x2b8   : > { %v2399_v10 = vadd.f32 %v2379_v32, %v2351_v3 }
 0x2ba   : > { %2408 = vst.msk [vmem:[#allocation3 + $0x8] sm:$0xff] %vm2406_vm1, %v2399_v10 }
 0x2bc   : > { %v2391_v47 = vpop.xlane.xlu1 %2390 }
 0x2bd   : > { %v2403_v9 = vadd.f32 %v2391_v47, %v2355_v5  ;;  %v2153_v5 = vld [vmem:[#allocation2 + $0x28] sm:$0xff] }
 0x2bf   : > { %2412 = vst.msk [vmem:[#allocation3 + $0x28] sm:$0xff] %vm2406_vm1, %v2403_v9 }
 0x2c0   : > { %v2388_v58 = vpop.xlane.xlu0 %2387 }
 0x2c1   : > { %v2402_v50 = vadd.f32 %v2388_v58, %v2354_v53 }
 0x2c3   : > { %2411 = vst.msk [vmem:[#allocation3 + $0x20] sm:$0xff] %vm2406_vm1, %v2402_v50  ;;  %v2397_v31 = vpop.xlane.xlu1 %2396 }
 0x2c4   : > { %v2405_v18 = vadd.f32 %v2397_v31, %v2357_v30 }
 0x2c6   : > { %v2394_v2 = vpop.xlane.xlu0 %2393  ;;  %2414 = vst.msk [vmem:[#allocation3 + $0x38] sm:$0xff] %vm2406_vm1, %v2405_v18 }
 0x2c7   : > { %v2404_v45 = vadd.f32 %v2394_v2, %v2356_v35 }
 0x2c9   : > { %2413 = vst.msk [vmem:[#allocation3 + $0x30] sm:$0xff] %vm2406_vm1, %v2404_v45 }
 0x34f   : > { %v3337_v0 = vpop.f32.mrb[96].mxu1 }
 0x350   : > { %v3338_v16 = vpop.f32.mrb[97].mxu1 }
 0x351   : > { %v3339_v13 = vadd.f32 %v3338_v16, %v3337_v0  ;;  %v3340_v22 = vpop.f32.mrb[98].mxu1  ;;  %v2154_v0 = vld [vmem:[#allocation2 + $0x30] sm:$0xff] }
 0x352   : > { %v3341_v11 = vpop.f32.mrb[99].mxu1 }
 0x353   : > { %v3342_v46 = vadd.f32 %v3341_v11, %v3340_v22  ;;  %v2155_v11 = vld [vmem:[#allocation2 + $0x38] sm:$0xff] }
 0x354   : > { %v3297_v51 = vpop.f32.mrb[96].mxu0 }
 0x355   : > { %v3298_v20 = vpop.f32.mrb[97].mxu0 }
 0x356   : > { %v3299_v21 = vadd.f32 %v3298_v20, %v3297_v51  ;;  %v3300_v38 = vpop.f32.mrb[98].mxu0 }
 0x357   : > { %v3301_v40 = vpop.f32.mrb[99].mxu0  ;;  %v3343_v48 = vpop.f32.mrb[100].mxu1 }
 0x358   : > { %v2304_v26 = vadd.f32 %v3339_v13, %v3299_v21  ;;  %v3302_v4 = vadd.f32 %v3301_v40, %v3300_v38  ;;  %v3344_v15 = vpop.f32.mrb[101].mxu1  ;;  %v2421_v21 = vld [vmem:[#allocation3 + $0x10] sm:$0xff] (!%p3094_p13)  ;;  %v2419_v38 = vld [vmem:[#allocation3] sm:$0xff] (!%p3094_p13)  ;;  %v3835_v40 = vmov (!%p3094_p13), 0  }
 0x359   : > { %v3345_v23 = vadd.f32 %v3344_v15, %v3343_v48  ;;  %v3346_v54 = vpop.f32.mrb[102].mxu1  ;;  %3704 = vset.pattern.permute.xlu1 (!%p3094_p13), %v3835_v40  ;;  %3703 = vset.pattern.permute.xlu0 (!%p3094_p13), %v3835_v40  ;;  %v2429_v48 = vmax.f32 (!%p3094_p13), %v2421_v21, 1.0  ;;  %v2420_v15 = vld [vmem:[#allocation3 + $0x8] sm:$0xff] (!%p3094_p13)  ;;  %v3719_v40 = vld [vmem:[%s5066_s9 + $0x30] sm:$0xff] (!%p3094_p13)  }
 0x35a   : > { %v2334_v44 = vadd.f32 %v2304_v26, %v2148_v24  ;;  %v2307_v29 = vadd.f32 %v3342_v46, %v3302_v4  ;;  %v3347_v43 = vpop.f32.mrb[103].mxu1  ;;  %v2422_v24 = vld [vmem:[#allocation3 + $0x18] sm:$0xff] (!%p3094_p13)  ;;  %v2427_v26 = vmax.f32 (!%p3094_p13), %v2419_v38, 1.0 }
 0x35b   : > { %v3348_v8 = vadd.f32 %v3347_v43, %v3346_v54  ;;  %v2430_v4 = vmax.f32 (!%p3094_p13), %v2422_v24, 1.0  ;;  %v2423_v54 = vld [vmem:[#allocation3 + $0x20] sm:$0xff] (!%p3094_p13)  ;;  %3721 = vrcp.f32 (!%p3094_p13), %v2429_v48  ;;  %v3706_v43 = vld [vmem:[%s5064_s7 + $0x8] sm:$0xff] (!%p3094_p13)   ;;  %v3720_v48 = vld [vmem:[%s5066_s9 + $0x38] sm:$0xff] (!%p3094_p13)  }
 0x35c   : > { %2342 = vst [vmem:[#allocation2] sm:$0xff] %v2334_v44  ;;  %v2335_v17 = vadd.f32 %v2307_v29, %v2149_v55  ;;  %v3303_v34 = vpop.f32.mrb[100].mxu0  ;;  %v2428_v55 = vmax.f32 (!%p3094_p13), %v2420_v15, 1.0  ;;  %v3705_v44 = vld [vmem:[%s5064_s7] sm:$0xff] (!%p3094_p13)   ;;  %v2426_v29 = vld [vmem:[#allocation3 + $0x38] sm:$0xff] (!%p3094_p13)  ;;  %3723 = vrcp.f32 (!%p3094_p13), %v2427_v26 }
 0x35d   : > { %v3304_v52 = vpop.f32.mrb[101].mxu0  ;;  %3481 = vmatprep.subr.bf16.mxu0 (!%p3094_p13), %v3705_v44  ;;  %3725 = vrcp.f32 (!%p3094_p13), %v2430_v4  ;;  %v3095_v26 = vld [vmem:[%s5065_s8] ss:$0 sm:$0xff] (!%p3094_p13) }
 0x35e   : > { %2343 = vst [vmem:[#allocation2 + $0x8] sm:$0xff] %v2335_v17  ;;  %v3305_v14 = vadd.f32 %v3304_v52, %v3303_v34  ;;  %v3306_v25 = vpop.f32.mrb[102].mxu0  ;;  %v2425_v17 = vld [vmem:[#allocation3 + $0x30] sm:$0xff] (!%p3094_p13)  ;;  %3482 = vmatpush3.bf16.msra.mxu0 (!%p3094_p13), %v3705_v44  ;;  %3727 = vrcp.f32 (!%p3094_p13), %v2428_v55  ;;  %v2431_v34 = vmax.f32 (!%p3094_p13), %v2423_v54, 1.0 }
 0x35f   : > { %v3307_v63 = vpop.f32.mrb[103].mxu0  ;;  %v3349_v6 = vpop.f32.mrb[104].mxu1  ;;  %3483 = vmatprep.subr.bf16.mxu0 (!%p3094_p13), %v3706_v43  ;;  %v3707_v52 = vld [vmem:[%s5064_s7 + $0x10] sm:$0xff] (!%p3094_p13)  }
 0x360   : > { %v2312_v36 = vadd.f32 %v3345_v23, %v3305_v14  ;;  %v3308_v57 = vadd.f32 %v3307_v63, %v3306_v25  ;;  %v3350_v49 = vpop.f32.mrb[105].mxu1  ;;  %v2424_v23 = vld [vmem:[#allocation3 + $0x28] sm:$0xff] (!%p3094_p13)  ;;  %v2434_v14 = vmax.f32 (!%p3094_p13), %v2426_v29, 1.0  ;;  %v2433_v25 = vmax.f32 (!%p3094_p13), %v2425_v17, 1.0 }
 0x361   : > { %v3351_v59 = vadd.f32 %v3350_v49, %v3349_v6  ;;  %v3352_v19 = vpop.f32.mrb[106].mxu1 }
 0x362   : > { %v2336_v62 = vadd.f32 %v2312_v36, %v2150_v41  ;;  %v2315_v27 = vadd.f32 %v3348_v8, %v3308_v57  ;;  %v3353_v60 = vpop.f32.mrb[107].mxu1  ;;  %v2432_v8 = vmax.f32 (!%p3094_p13), %v2424_v23, 1.0  ;;  %3484 = vmatpush3.bf16.msra.mxu0 (!%p3094_p13), %v3706_v43  ;;  %v3708_v41 = vld [vmem:[%s5064_s7 + $0x18] sm:$0xff] (!%p3094_p13)   ;;  %v3709_v36 = vld [vmem:[%s5064_s7 + $0x20] sm:$0xff] (!%p3094_p13)  }
 0x363   : > { %v3354_v42 = vadd.f32 %v3353_v60, %v3352_v19  ;;  %3485 = vmatprep.subr.bf16.mxu0 (!%p3094_p13), %v3707_v52 }
 0x364   : > { %2344 = vst [vmem:[#allocation2 + $0x10] sm:$0xff] %v2336_v62  ;;  %v2337_v61 = vadd.f32 %v2315_v27, %v2151_v56  ;;  %v3309_v7 = vpop.f32.mrb[104].mxu0  ;;  %3729 = vrcp.f32 (!%p3094_p13), %v2432_v8  ;;  %v3710_v56 = vld [vmem:[%s5064_s7 + $0x28] sm:$0xff] (!%p3094_p13)   ;;  %v3711_v62 = vld [vmem:[%s5064_s7 + $0x30] sm:$0xff] (!%p3094_p13)  }
 0x365   : > { %v3310_v12 = vpop.f32.mrb[105].mxu0  ;;  %3731 = vrcp.f32 (!%p3094_p13), %v2431_v34  ;;  %v3722_v63 = vpop.eup (!%p3094_p13), %3721 }
 0x366   : > { %2345 = vst [vmem:[#allocation2 + $0x18] sm:$0xff] %v2337_v61  ;;  %v3311_v39 = vadd.f32 %v3310_v12, %v3309_v7  ;;  %v3312_v28 = vpop.f32.mrb[106].mxu0  ;;  %3733 = vrcp.f32 (!%p3094_p13), %v2434_v14  ;;  %3486 = vmatpush3.bf16.msra.mxu0 (!%p3094_p13), %v3707_v52  ;;  %v3724_v6 = vpop.eup (!%p3094_p13), %3723  ;;  %2463 = vperm.xlu1 (!%p3094_p13), %3704, %v3722_v63   ;;  %v3713_v61 = vld [vmem:[%s5066_s9] sm:$0xff] (!%p3094_p13)   ;;  %v3714_v7 = vld [vmem:[%s5066_s9 + $0x8] sm:$0xff] (!%p3094_p13)   ;;  %v3715_v12 = vld [vmem:[%s5066_s9 + $0x10] sm:$0xff] (!%p3094_p13)  }
 0x367   : > { %v3313_v37 = vpop.f32.mrb[107].mxu0  ;;  %v3355_v3 = vpop.f32.mrb[108].mxu1  ;;  %3735 = vrcp.f32 (!%p3094_p13), %v2433_v25  ;;  %3487 = vmatprep.subr.bf16.mxu0 (!%p3094_p13), %v3708_v41  ;;  %2453 = vperm.xlu0 (!%p3094_p13), %3703, %v3724_v6  }
 0x368   : > { %v2320_v32 = vadd.f32 %v3351_v59, %v3311_v39  ;;  %v3314_v1 = vadd.f32 %v3313_v37, %v3312_v28  ;;  %v3356_v10 = vpop.f32.mrb[109].mxu1  ;;  %v3726_v57 = vpop.eup (!%p3094_p13), %3725  ;;  %3505 = vmatprep.subr.bf16.mxu1 (!%p3094_p13), %v3713_v61  ;;  %v3716_v39 = vld [vmem:[%s5066_s9 + $0x18] sm:$0xff] (!%p3094_p13)   ;;  %v3717_v28 = vld [vmem:[%s5066_s9 + $0x20] sm:$0xff] (!%p3094_p13)  }
 0x369   : > { %v3357_v47 = vadd.f32 %v3356_v10, %v3355_v3  ;;  %v3358_v53 = vpop.f32.mrb[110].mxu1  ;;  %v3728_v49 = vpop.eup (!%p3094_p13), %3727  ;;  %3506 = vmatpush3.bf16.msra.mxu1 (!%p3094_p13), %v3713_v61  ;;  %v2443_v10 = vld [vmem:[#allocation2] sm:$0xff] (!%p3094_p13) }
 0x36a   : > { %v2338_v58 = vadd.f32 %v2320_v32, %v2152_v33  ;;  %v2323_v9 = vadd.f32 %v3354_v42, %v3314_v1  ;;  %v3359_v50 = vpop.f32.mrb[111].mxu1  ;;  %3488 = vmatpush3.bf16.msra.mxu0 (!%p3094_p13), %v3708_v41  ;;  %2468 = vperm.xlu1 (!%p3094_p13), %3704, %v3726_v57   ;;  %v3712_v42 = vld [vmem:[%s5064_s7 + $0x38] sm:$0xff] (!%p3094_p13)   ;;  %v3718_v33 = vld [vmem:[%s5066_s9 + $0x28] sm:$0xff] (!%p3094_p13)  }
 0x36b   : > { %v3360_v30 = vadd.f32 %v3359_v50, %v3358_v53  ;;  %3489 = vmatprep.subr.bf16.mxu0 (!%p3094_p13), %v3709_v36  ;;  %2458 = vperm.xlu0 (!%p3094_p13), %3703, %v3728_v49   ;;  %v2445_v32 = vld [vmem:[#allocation2 + $0x10] sm:$0xff] (!%p3094_p13) }
 0x36c   : > { %2346 = vst [vmem:[#allocation2 + $0x20] sm:$0xff] %v2338_v58  ;;  %v2339_v31 = vadd.f32 %v2323_v9, %v2153_v5  ;;  %v3315_v35 = vpop.f32.mrb[108].mxu0  ;;  %3507 = vmatprep.subr.bf16.mxu1 (!%p3094_p13), %v3714_v7  ;;  %v2444_v5 = vld [vmem:[#allocation2 + $0x8] sm:$0xff] (!%p3094_p13) }
 0x36d   : > { %v3316_v2 = vpop.f32.mrb[109].mxu0  ;;  %3508 = vmatpush3.bf16.msra.mxu1 (!%p3094_p13), %v3714_v7  ;;  %v2446_v1 = vld [vmem:[#allocation2 + $0x18] sm:$0xff] (!%p3094_p13)  ;;  %v3104_v7 = vld [vmem:[%s5067_s10] ss:$0 sm:$0xff] (!%p3094_p13) }
 0x36e   : > { %2347 = vst [vmem:[#allocation2 + $0x28] sm:$0xff] %v2339_v31  ;;  %v3317_v18 = vadd.f32 %v3316_v2, %v3315_v35  ;;  %v3318_v45 = vpop.f32.mrb[110].mxu0  ;;  %v3730_v59 = vpop.eup (!%p3094_p13), %3729  ;;  %3490 = vmatpush3.bf16.msra.mxu0 (!%p3094_p13), %v3709_v36  ;;  %3509 = vmatprep.subr.bf16.mxu1 (!%p3094_p13), %v3715_v12 }
 0x36f   : > { %v3319_v16 = vpop.f32.mrb[111].mxu0  ;;  %v3732_v19 = vpop.eup (!%p3094_p13), %3731  ;;  %2478 = vperm.xlu1 (!%p3094_p13), %3704, %v3730_v59   ;;  %3491 = vmatprep.subr.bf16.mxu0 (!%p3094_p13), %v3710_v56 }
 0x370   : > { %v2328_v13 = vadd.f32 %v3357_v47, %v3317_v18  ;;  %v3320_v22 = vadd.f32 %v3319_v16, %v3318_v45  ;;  %2418 = sbr.rel (%p3094_p13) target bundleno = 1458 (0x5b2), region = 72  ;;  %v3734_v27 = vpop.eup (!%p3094_p13), %3733  ;;  %2473 = vperm.xlu0 (!%p3094_p13), %3703, %v3732_v19  }
 0x371   : > { %v3736_v60 = vpop.eup (!%p3094_p13), %3735  ;;  %3510 = vmatpush3.bf16.msra.mxu1 (!%p3094_p13), %v3715_v12 }
 0x372   : > { %v2340_v46 = vadd.f32 %v2328_v13, %v2154_v0  ;;  %v2331_v51 = vadd.f32 %v3360_v30, %v3320_v22  ;;  %3492 = vmatpush3.bf16.msra.mxu0 (!%p3094_p13), %v3710_v56  ;;  %3511 = vmatprep.subr.bf16.mxu1 (!%p3094_p13), %v3716_v39 }
 0x373   : > { %2488 = vperm.xlu1 (!%p3094_p13), %3704, %v3734_v27   ;;  %3493 = vmatprep.subr.bf16.mxu0 (!%p3094_p13), %v3711_v62  ;;  %v2447_v2 = vld [vmem:[#allocation2 + $0x20] sm:$0xff] (!%p3094_p13) }
 0x374   : > { %2348 = vst [vmem:[#allocation2 + $0x30] sm:$0xff] %v2340_v46  ;;  %v2341_v20 = vadd.f32 %v2331_v51, %v2155_v11  ;;  %2483 = vperm.xlu0 (!%p3094_p13), %3703, %v3736_v60  }
 0x375   : > { %3512 = vmatpush3.bf16.msra.mxu1 (!%p3094_p13), %v3716_v39  ;;  %v2448_v31 = vld [vmem:[#allocation2 + $0x28] sm:$0xff] (!%p3094_p13) }
 0x376   : > { %2349 = vst [vmem:[#allocation2 + $0x38] sm:$0xff] %v2341_v20  ;;  %3494 = vmatpush3.bf16.msra.mxu0 (!%p3094_p13), %v3711_v62  ;;  %3513 = vmatprep.subr.bf16.mxu1 (!%p3094_p13), %v3717_v28 }
 0x377   : > { %3495 = vmatprep.subr.bf16.mxu0 %v3712_v42 }
 0x379   : > { %3514 = vmatpush3.bf16.msra.mxu1 %v3717_v28 }
 0x37a   : > { %3496 = vmatpush3.bf16.msra.mxu0 %v3712_v42  ;;  %3515 = vmatprep.subr.bf16.mxu1 %v3718_v33 }
 0x37b   : > { %v2449_v11 = vld [vmem:[#allocation2 + $0x30] sm:$0xff] }
 0x37d   : > { %3516 = vmatpush3.bf16.msra.mxu1 %v3718_v33  ;;  %v2450_v22 = vld [vmem:[#allocation2 + $0x38] sm:$0xff] }
 0x37e   : > { %3517 = vmatprep.subr.bf16.mxu1 %v3719_v40 }
 0x381   : > { %3518 = vmatpush3.bf16.msra.mxu1 %v3719_v40 }
 0x382   : > { %3519 = vmatprep.subr.bf16.mxu1 %v3720_v48 }
 0x385   : > { %3520 = vmatpush3.bf16.msra.mxu1 %v3720_v48 }
 0x3e5   : > { %v2464_v37 = vpop.permute.xlu1 %2463 }
 0x3e6   : > { %v2454_v3 = vpop.permute.xlu0 %2453  ;;  %v2493_v53 = vmul.f32 %v2464_v37, %v2445_v32 }
 0x3e7   : > { %v2491_v50 = vmul.f32 %v2454_v3, %v2443_v10 }
 0x3e9   : > { %v2469_v47 = vpop.permute.xlu1 %2468 }
 0x3ea   : > { %v2494_v58 = vmul.f32 %v2469_v47, %v2446_v1  ;;  %v2459_v9 = vpop.permute.xlu0 %2458 }
 0x3eb   : > { %v2492_v30 = vmul.f32 %v2459_v9, %v2444_v5 }
 0x3ec   : > { %v2500_v35 = vpack.c.bf16 %v2494_v58, %v2493_v53 }
 0x3ed   : > { %v2499_v45 = vpack.c.bf16 %v2492_v30, %v2491_v50 }
 0x3ee   : > { %v2479_v18 = vpop.permute.xlu1 %2478 }
 0x3ef   : > { %v2496_v0 = vmul.f32 %v2479_v18, %v2448_v31  ;;  %v2474_v16 = vpop.permute.xlu0 %2473  ;;  %3497 = vmatprep.mubr.bf16.mxu0 %v2499_v45 }
 0x3f0   : > { %v2495_v13 = vmul.f32 %v2474_v16, %v2447_v2  ;;  %3498 = vmatmul.mubr.bf16.vlgmr.msra.gmra.mrb[0].mxu0 %v2500_v35 }
 0x3f2   : > { %v2501_v46 = vpack.c.bf16 %v2496_v0, %v2495_v13  ;;  %v2489_v51 = vpop.permute.xlu1 %2488 }
 0x3f3   : > { %v2498_v20 = vmul.f32 %v2489_v51, %v2450_v22  ;;  %v2484_v21 = vpop.permute.xlu0 %2483 }
 0x3f4   : > { %v2497_v38 = vmul.f32 %v2484_v21, %v2449_v11  ;;  %3501 = vmatprep.mubr.bf16.mxu0 %v2501_v46 }
 0x3f6   : > { %v2502_v24 = vpack.c.bf16 %v2498_v20, %v2497_v38 }
 0x3f8   : > { %3502 = vmatmul.mubr.bf16.gmra.mrb[4].mxu0 %v2502_v24 }
 0x4c3   : > { %v3499_v4 = vpop.f32.mrb[0].mxu0 }
 0x4c4   : > { %v2617_v15 = vadd.f32 %v3499_v4, %v3095_v26  ;;  %v2608_v55 = vpop.f32.mrb[1].mxu0 }
 0x4c5   : > { %v2609_v23 = vadd.f32 %v3095_v26, %v2608_v55  ;;  %v3500_v54 = vpop.f32.mrb[2].mxu0 }
 0x4c6   : > { %v2620_v44 = vadd.f32 %v3500_v54, %v3095_v26  ;;  %v2611_v29 = vpop.f32.mrb[3].mxu0  ;;  %v2641_v8 = vmax.f32 %v2617_v15, 0.0 }
 0x4c7   : > { %v2612_v43 = vadd.f32 %v3095_v26, %v2611_v29  ;;  %v2639_v34 = vmax.f32 %v2609_v23, 0.0 }
 0x4c8   : > { %v2642_v17 = vmax.f32 %v2620_v44, 0.0 }
 0x4c9   : > { %v2640_v52 = vmax.f32 %v2612_v43, 0.0 }
 0x4ca   : > { %v2648_v14 = vpack.c.bf16 %v2642_v17, %v2641_v8 }
 0x4cb   : > { %v3503_v25 = vpop.f32.mrb[4].mxu0  ;;  %v2647_v41 = vpack.c.bf16 %v2640_v52, %v2639_v34 }
 0x4cc   : > { %v2633_v63 = vadd.f32 %v3503_v25, %v3095_v26  ;;  %v2624_v6 = vpop.f32.mrb[5].mxu0 }
 0x4cd   : > { %v2625_v36 = vadd.f32 %v3095_v26, %v2624_v6  ;;  %v3504_v57 = vpop.f32.mrb[6].mxu0  ;;  %3521 = vmatprep.mubr.bf16.mxu1 %v2647_v41 }
 0x4ce   : > { %v2636_v49 = vadd.f32 %v3504_v57, %v3095_v26  ;;  %v2627_v56 = vpop.f32.mrb[7].mxu0  ;;  %3522 = vmatmul.mubr.bf16.vlgmr.msra.gmra.mrb[0].mxu1 %v2648_v14  ;;  %v2645_v19 = vmax.f32 %v2633_v63, 0.0 }
 0x4cf   : > { %v2628_v59 = vadd.f32 %v3095_v26, %v2627_v56  ;;  %v2643_v27 = vmax.f32 %v2625_v36, 0.0 }
 0x4d0   : > { %v2646_v62 = vmax.f32 %v2636_v49, 0.0 }
 0x4d1   : > { %v2644_v60 = vmax.f32 %v2628_v59, 0.0 }
 0x4d2   : > { %v2650_v42 = vpack.c.bf16 %v2646_v62, %v2645_v19 }
 0x4d3   : > { %v2649_v61 = vpack.c.bf16 %v2644_v60, %v2643_v27 }
 0x4d5   : > { %3525 = vmatprep.mubr.bf16.mxu1 %v2649_v61 }
 0x4d6   : > { %3526 = vmatmul.mubr.bf16.gmra.mrb[4].mxu1 %v2650_v42 }
 0x5a1   : > { %v3523_v12 = vpop.f32.mrb[0].mxu1 }
 0x5a2   : > { %v2765_v39 = vadd.f32 %v3523_v12, %v3104_v7  ;;  %v2756_v28 = vpop.f32.mrb[1].mxu1 }
 0x5a3   : > { %v2757_v33 = vadd.f32 %v3104_v7, %v2756_v28  ;;  %v3524_v37 = vpop.f32.mrb[2].mxu1 }
 0x5a4   : > { %v2789_v3 = vmax.f32 %v2765_v39, 0.0  ;;  %v2768_v32 = vadd.f32 %v3524_v37, %v3104_v7  ;;  %v2759_v1 = vpop.f32.mrb[3].mxu1 }
 0x5a5   : > { %v2787_v10 = vmax.f32 %v2757_v33, 0.0  ;;  %v2760_v5 = vadd.f32 %v3104_v7, %v2759_v1 }
 0x5a6   : > { %2797 = vst [vmem:[#allocation4 + $0x10] sm:$0xff] %v2789_v3  ;;  %v2790_v47 = vmax.f32 %v2768_v32, 0.0 }
 0x5a7   : > { %2795 = vst [vmem:[#allocation4] sm:$0xff] %v2787_v10  ;;  %v2788_v53 = vmax.f32 %v2760_v5, 0.0 }
 0x5a8   : > { %2798 = vst [vmem:[#allocation4 + $0x18] sm:$0xff] %v2790_v47 }
 0x5a9   : > { %2796 = vst [vmem:[#allocation4 + $0x8] sm:$0xff] %v2788_v53  ;;  %v3527_v58 = vpop.f32.mrb[4].mxu1 }
 0x5aa   : > { %v2781_v9 = vadd.f32 %v3527_v58, %v3104_v7  ;;  %v2772_v50 = vpop.f32.mrb[5].mxu1 }
 0x5ab   : > { %v2773_v30 = vadd.f32 %v3104_v7, %v2772_v50  ;;  %v3528_v31 = vpop.f32.mrb[6].mxu1 }
 0x5ac   : > { %v2793_v35 = vmax.f32 %v2781_v9, 0.0  ;;  %v2784_v2 = vadd.f32 %v3528_v31, %v3104_v7  ;;  %v2775_v18 = vpop.f32.mrb[7].mxu1 }
 0x5ad   : > { %v2791_v45 = vmax.f32 %v2773_v30, 0.0  ;;  %v2776_v0 = vadd.f32 %v3104_v7, %v2775_v18 }
 0x5ae   : > { %2801 = vst [vmem:[#allocation4 + $0x30] sm:$0xff] %v2793_v35  ;;  %v2794_v16 = vmax.f32 %v2784_v2, 0.0 }
 0x5af   : > { %2799 = vst [vmem:[#allocation4 + $0x20] sm:$0xff] %v2791_v45  ;;  %v2792_v13 = vmax.f32 %v2776_v0, 0.0 }
 0x5b0   : > { %2802 = vst [vmem:[#allocation4 + $0x38] sm:$0xff] %v2794_v16 }
 0x5b1   : > { %2800 = vst [vmem:[#allocation4 + $0x28] sm:$0xff] %v2792_v13 }
 0x5b2 PF: > { %s3836_s26 = smov [#allocation4]  }
 0x5b3   : > { %s2814_s27 = sshll.u32 %s3836_s26, 4  ;;  %s2815_s27 = int_to_ptr.vmem [resolvable:$true] %s2814_s27 }
 0x5b4   : > { %s3737_s14 = scalar_lea.vmem %s2815_s27, 1024  ;;  %p3744_p4 = scmp.lt.s32.totalorder %s2815_s27, %s2815_s27 }
 0x5b5   : > { %p3738_p0 = scmp.ne.s32.totalorder %s2815_s27, %s3737_s14  ;;  %p3745_p7 = scmp.lt.s32.totalorder %s3737_s14, %s3737_s14 }
 0x5b7   : > { %p3739_p1 = pnand %p3738_p0, %p312_p2  ;;  %p3746_p8 = por %p3745_p7, %p3744_p4 }
 0x5b9   : > { %p3740_p3 = pneg %p3739_p1 }
 0x5bb   : > { %p3747_p9 = pnand %p3746_p8, %p3740_p3 }
 0x5bd   : > { %3750 = shalt.err (!%p3747_p9)
}
 0x5be   : > { %s3751_s18 = scalar_lea.hbm %s5068_s11, 1024 }
 0x5bf   : > { %p3752_p10 = scmp.ne.s32.totalorder %s5068_s11, %s3751_s18  ;;  %p3757_p13 = scmp.lt.u32.totalorder %s3751_s18, %s5068_s11 }
 0x5c1   : > { %p3753_p11 = pnand %p3752_p10, %p312_p2 }
 0x5c3   : > { %p3754_p12 = pneg %p3753_p11 }
 0x5c5   : > { %p3759_p0 = pnand %p3757_p13, %p3754_p12 }
 0x5c7   : > { %3762 = shalt.err (!%p3759_p0)
}
 0x5c8   : > { %s3837_s28 = smov 128   ;;  %s3838_s29 = smov 8  }
 0x5c9   : > { %3531 = dma.vmem_to_hbm [thread:$0]  (%p312_p2), %s2815_s27, 1024, %s5068_s11, [#allocation5], %s3837_s28, %s3837_s28, %s3838_s29  }
 0x5ca   : > { %s3120_s14 = sshll.u32 %s3926_s25, 12  ;;  %s2830_s16 = sshll.u32 %s3975_s21, 4  ;;  %s5005_s16 = int_to_ptr.vmem [resolvable:$true] %s2830_s16 }
 0x5cb   : > { %s5003_s19 = scalar_lea.hbm %s5069_s12, %s3120_s14  ;;  %s5178_s20 = sand.u32 1, %s3821_s22  }
 0x5cc   : > { %s5009_s30 = scalar_lea.sflag [#allocation7], %s5178_s20  ;;  %s3763_s15 = scalar_lea.vmem %s5005_s16, 4096 }
 0x5cd   : > { %p3764_p1 = scmp.ne.s32.totalorder %s5005_s16, %s3763_s15  ;;  %s3839_s27 = smov [#allocation6]  }
 0x5ce   : > { %s3767_s21 = sshll.u32 %s3839_s27, 4  ;;  %s3768_s21 = int_to_ptr.vmem [resolvable:$false] %s3767_s21 }
 0x5cf   : > { %p3765_p3 = pnand %p3764_p1, %p3945_p5  ;;  %s3769_s23 = scalar_lea.vmem %s3768_s21, 8192 }
 0x5d0   : > { %p3770_p7 = scmp.lt.s32.totalorder %s5005_s16, %s3768_s21  ;;  %p3771_p8 = scmp.lt.s32.totalorder %s3769_s23, %s3763_s15 }
 0x5d1   : > { %p3766_p4 = pneg %p3765_p3 }
 0x5d2   : > { %p3772_p9 = por %p3771_p8, %p3770_p7 }
 0x5d4   : > { %p3773_p10 = pnand %p3772_p9, %p3766_p4 }
 0x5d6   : > { %3776 = shalt.err (!%p3773_p10)
}
 0x5d7   : > { %s3777_s26 = scalar_lea.hbm %s5003_s19, 4096  ;;  %s3781_s18 = scalar_lea.hbm %s5069_s12, 8192 }
 0x5d8   : > { %p3778_p11 = scmp.ne.s32.totalorder %s5003_s19, %s3777_s26  ;;  %p3782_p0 = scmp.lt.u32.totalorder %s5003_s19, %s5069_s12 }
 0x5d9   : > { %p3783_p1 = scmp.lt.u32.totalorder %s3781_s18, %s3777_s26  ;;  %p3785_p4 = scmp.lt.u32.totalorder %s3777_s26, %s5003_s19 }
 0x5da   : > { %p3779_p12 = pnand %p3778_p11, %p3945_p5 }
 0x5db   : > { %p3784_p3 = por %p3783_p1, %p3782_p0 }
 0x5dc   : > { %p3780_p13 = pneg %p3779_p12 }
 0x5dd   : > { %p3786_p7 = por %p3785_p4, %p3784_p3 }
 0x5df   : > { %p3787_p8 = pnand %p3786_p7, %p3780_p13 }
 0x5e1   : > { %3790 = shalt.err (!%p3787_p8)
}
 0x5e2   : > { %3532 = dma.vmem_to_hbm [thread:$0]  (%p3945_p5), %s5005_s16, 4096, %s5003_s19, %s5009_s30, %s3837_s28, %s3837_s28, %s3838_s29  }
 0x5e3   : > { %3808 = dma.done.wait (%p312_p2), [#allocation5], 1024  }
 0x5e4   : > { %3810 = vsyncadd (%p312_p2), [#allocation5], 4294966272 }
 0x5e5 PF: > { %s5179_s15 = sld [smem:[#allocation10_spill]]  ;;  %p3542_p9 = scmp.ge.s32.totalorder %s3829_s24, 2 }
 0x5e7   : > { %p3537_p10 = pnand %p3542_p9, %p3949_p6 }
 0x5eb   : > { %s2849_s23 = sand.u32 1, %s5179_s15  }
 0x5ec   : > { %s2850_s13 = scalar_lea.sflag [#allocation7], %s2849_s23 }
 0x5ed   : > { %3812 = dma.done.wait (!%p3537_p10), %s2850_s13, 4096  }
 0x5ee   : > { %3814 = vsyncadd (!%p3537_p10), %s2850_s13, 4294963200  ;;  %s5181_s24 = sld [smem:[#allocation12_spill]]  ;;  %s5182_s26 = sld [smem:[#allocation11_spill]] }
 0x5ef   : > { %s5183_s23 = sld [smem:[#allocation13_spill]]  ;;  %s5184_s21 = smov %s3821_s22 }
 0x5f4   : > { %p24_p5 = scmp.ge.s32.totalorder %s5181_s24, 4   ;;  %s5185_s22 = smov %s5182_s26 }
 0x5f6   :  { %26 = sbr.rel (!%p24_p5) target bundleno = 4 (0x4), region = 122 }
 0x5fd   :  { %2855 = vsyncpa [#allocation5], 1 }
 0x5fe   :  { %2857 = vsyncpa [#allocation5 + $0x1], 1 }
 0x5ff   :  { %2858 = vsyncpa [#allocation7], 1 }
 0x600   :  { %2860 = vsyncpa [#allocation7 + $0x1], 1 }

</bundles_post_ra>
